<compile_context>
chip_gen: v6e
topology: v6e:2x2x1
jax: 0.10.0
libtpu: 0.0.40
codegen_flags: <defaults>
</compile_context>

<pallas_src>
import functools
import math

import jax
import jax.numpy as jnp
from jax.experimental import pallas as pl
from jax.experimental.pallas import tpu as pltpu

# Finite stand-in for -inf: avoids (-inf) - (-inf) = NaN in the discarded
# junk columns of the flattened compute space.
_NEG_BIG = -1e30


def _morph_kernel(wblk_ref, wmax_ref, lc_ref, x_ref, mask_ref, o_ref, e_ref, *,
                  BB, C, k, Wp, Lcp, n_dil, n_ero, beta):
    """Processes BB batch elements per grid step.

    wblk_ref: VMEM f32[BB*n_out, 2*T_all]  batch-block-diagonal, per-output
              normalized exp(beta*w - wmax); dilation half then erosion half.
    wmax_ref: VMEM f32[BB*n_out, 1]        per-output max(beta*w), batch-tiled.
    lc_ref  : VMEM f32[OC, n_out]          1x1 weights with sign & 1/beta folded.
    x_ref   : VMEM f32[1, BB*C, Lf]        zero-padded flattened grid (no beta).
    mask_ref: VMEM f32[1, Lf]              0 on real pixels, -BIG on halo/tail.
    o_ref   : VMEM f32[BB, OC, Lcp]        output in flattened padded-row space.
    e_ref   : VMEM f32[2*T_all, Lcp]       scratch: raw dil taps -> exp'd taps.
    """
    n_out = n_dil + n_ero
    KK = k * k
    BBC = BB * C
    T_all = KK * BBC

    xb = x_ref[0] * beta                        # (BBC, Lf) one-time beta fold
    msk = mask_ref[...]                         # (1, Lf)

    # ---- Pass 1: per-shift extraction, all channels & sub-batches at once --
    m_acc_d = None
    m_acc_e = None
    for s in range(KK):
        ki, kj = divmod(s, k)
        d = ki * Wp + kj                        # pure lane shift in flat space
        xs = xb[:, d:d + Lcp]                   # (BBC, Lcp)
        ms = msk[:, d:d + Lcp]                  # (1, Lcp)
        tap_d = xs + ms                         # dilation taps
        tap_e = ms - xs                         # erosion taps (max only)
        r0 = s * BBC
        e_ref[r0:r0 + BBC, :] = tap_d           # full-sublane block store
        if s == 0:
            m_acc_d, m_acc_e = tap_d, tap_e
        else:
            m_acc_d = jnp.maximum(m_acc_d, tap_d)
            m_acc_e = jnp.maximum(m_acc_e, tap_e)

    # Per-batch cross-sublane reduce of the running maxima.
    m_d = [jnp.max(m_acc_d[b * C:(b + 1) * C, :], axis=0, keepdims=True)
           for b in range(BB)]
    m_e = [jnp.max(m_acc_e[b * C:(b + 1) * C, :], axis=0, keepdims=True)
           for b in range(BB)]
    # Hoisted broadcasts (JAX does not CSE broadcast_in_dim).
    m_d_full = jnp.concatenate(
        [jnp.broadcast_to(m_d[b], (C, Lcp)) for b in range(BB)], axis=0)
    m_e_full = jnp.concatenate(
        [jnp.broadcast_to(m_e[b], (C, Lcp)) for b in range(BB)], axis=0)

    # ---- Pass 2: in-place exp; erosion taps derived as 2*mask - dil tap -----
    msk2 = msk * 2.0
    for s in range(KK):
        ki, kj = divmod(s, k)
        d = ki * Wp + kj
        r0 = s * BBC
        tap_d = e_ref[r0:r0 + BBC, :]
        e_ref[r0:r0 + BBC, :] = jnp.exp(tap_d - m_d_full)
        cs = msk2[:, d:d + Lcp] - m_e_full                  # (BBC, Lcp)
        e_ref[T_all + r0:T_all + r0 + BBC, :] = jnp.exp(cs - tap_d)

    # ---- Pass 3: one MXU matmul reduces all taps for every (batch, output) --
    acc = jnp.dot(wblk_ref[...], e_ref[...],
                  preferred_element_type=jnp.float32)       # (BB*n_out, Lcp)

    # logsumexp finalize: lse = m + max(beta*w) + log(acc); erosion sign and
    # 1/beta are folded into lc, so out = lc_fold @ [lse_dil; lse_ero].
    lacc = jnp.log(acc) + wmax_ref[...]                     # (BB*n_out, Lcp)
    lc = lc_ref[...]                                        # (OC, n_out)
    for b in range(BB):
        base = b * n_out
        ld = lacc[base:base + n_dil, :] + m_d[b]
        le = lacc[base + n_dil:base + n_out, :] + m_e[b]
        cat_b = jnp.concatenate([ld, le], axis=0)           # (n_out, Lcp)
        out_b = lc[:, 0:1] * cat_b[0:1, :]                  # (OC, Lcp)
        for c2 in range(1, n_out):
            out_b = out_b + lc[:, c2:c2 + 1] * cat_b[c2:c2 + 1, :]
        o_ref[b, :, :] = out_b.astype(o_ref.dtype)


def morph_block_2d(x, w_dil, w_ero, lc_weight, beta=20.0):
    """x: (B, C, H, W) f32. w_dil: (n_dil, C, k, k). w_ero: (n_ero, C, k, k).
    lc_weight: (1, OC, n_dil+n_ero, 1, 1). Returns (B, OC, H, W) f32."""
    B, C, H, W = x.shape
    n_dil, _, k, _ = w_dil.shape
    n_ero = w_ero.shape[0]
    OC = lc_weight.shape[1]
    n_out = n_dil + n_ero
    KK = k * k

    pad_b = (k - 1) // 2
    pad_e = (k - 1) - pad_b
    Hp, Wp = H + k - 1, W + k - 1
    Lc = H * Wp                                 # real flattened output length
    Lcp = -(-Lc // 128) * 128                   # lane-dense compute width
    d_max = (k - 1) * Wp + (k - 1)
    Lf = -(-(Lcp + d_max) // 128) * 128         # input slab covers every shift

    # Sub-batch factor: pack BB batch elements along the sublane axis so the
    # per-shift extraction / max / exp blocks fill (up to) 8 sublanes.
    BB = 1
    start = min(B, 8 // C) if C <= 8 else 1
    for cand in range(max(start, 1), 0, -1):
        if B % cand == 0:
            BB = cand
            break
    BBC = BB * C
    T_all = KK * BBC

    # Single zero-padded, flattened input slab (the only big HBM input).
    xpad = jnp.pad(x.astype(jnp.float32),
                   ((0, 0), (0, 0), (pad_b, pad_e), (pad_b, pad_e)))
    xflat = xpad.reshape(B, C, Hp * Wp)
    xflat = jnp.pad(xflat, ((0, 0), (0, 0), (0, Lf - Hp * Wp)))
    xflat = xflat.reshape(B // BB, BBC, Lf)

    # Source-position validity mask (0 on real pixels, -BIG on halo / tail).
    q = jnp.arange(Lf)
    r, cc = q // Wp, q % Wp
    valid = ((q < Hp * Wp) & (r >= pad_b) & (r < pad_b + H)
             & (cc >= pad_b) & (cc < pad_b + W))
    mask = jnp.where(valid, 0.0, _NEG_BIG).astype(jnp.float32)[None, :]

    # Per-output-normalized weights: exp(beta*w - max(beta*w)) never overflows;
    # max(beta*w) is added back at the finalize (stability fix from review).
    wd = (beta * w_dil).astype(jnp.float32)              # (n_dil, C, k, k)
    we = (beta * w_ero).astype(jnp.float32)
    wmax_d = wd.reshape(n_dil, -1).max(axis=1)           # (n_dil,)
    wmax_e = we.reshape(n_ero, -1).max(axis=1)
    # Tap order inside e_ref: (half, shift, sub-batch, channel).
    wd_n = jnp.exp(wd - wmax_d[:, None, None, None]).transpose(0, 2, 3, 1)
    wd_n = wd_n.reshape(n_dil, KK, C)
    we_n = jnp.exp(we - wmax_e[:, None, None, None]).transpose(0, 2, 3, 1)
    we_n = we_n.reshape(n_ero, KK, C)

    # Batch-block-diagonal MXU weight: rows (b, o), cols (half, s, b, c).
    wbig = jnp.zeros((BB, n_out, 2, KK, BB, C), jnp.float32)
    for b in range(BB):
        wbig = wbig.at[b, :n_dil, 0, :, b, :].set(wd_n)
        wbig = wbig.at[b, n_dil:, 1, :, b, :].set(we_n)
    wbig = wbig.reshape(BB * n_out, 2 * T_all)

    wmax_all = jnp.tile(jnp.concatenate([wmax_d, wmax_e]), BB)[:, None]

    # Fold erosion sign and 1/beta into the tiny 1x1 combination weights.
    lc = lc_weight.reshape(OC, n_out).astype(jnp.float32)
    lc_fold = jnp.concatenate([lc[:, :n_dil], -lc[:, n_dil:]], axis=1) / beta

    kernel = functools.partial(
        _morph_kernel, BB=BB, C=C, k=k, Wp=Wp, Lcp=Lcp,
        n_dil=n_dil, n_ero=n_ero, beta=float(beta))

    cost = pl.CostEstimate(
        flops=int(B * (C * Lf + 8 * KK * C * Lcp + 4 * n_out * KK * C * Lcp
                       + 2 * OC * n_out * Lcp + 4 * n_out * Lcp)),
        transcendentals=int(B * (2 * KK * C + n_out) * Lcp),
        bytes_accessed=int(4 * (B * C * Lf + Lf + BB * n_out * 2 * T_all
                                + BB * n_out + OC * n_out + B * OC * Lcp)),
    )

    out_flat = pl.pallas_call(
        kernel,
        out_shape=jax.ShapeDtypeStruct((B, OC, Lcp), jnp.float32),
        grid_spec=pltpu.PrefetchScalarGridSpec(
            num_scalar_prefetch=0,
            grid=(B // BB,),
            in_specs=[
                pl.BlockSpec((BB * n_out, 2 * T_all), lambda g: (0, 0)),
                pl.BlockSpec((BB * n_out, 1), lambda g: (0, 0)),
                pl.BlockSpec((OC, n_out), lambda g: (0, 0)),
                pl.BlockSpec((1, BBC, Lf), lambda g: (g, 0, 0)),
                pl.BlockSpec((1, Lf), lambda g: (0, 0)),
            ],
            out_specs=pl.BlockSpec((BB, OC, Lcp), lambda g: (g, 0, 0)),
            scratch_shapes=[pltpu.VMEM((2 * T_all, Lcp), jnp.float32)],
        ),
        compiler_params=pltpu.CompilerParams(
            # TODO(synk): pltpu.CORE_PARALLEL (or pl.core_map) on this axis to
            # engage both v7x TensorCores; "parallel" kept for portability.
            dimension_semantics=("parallel",),
            vmem_limit_bytes=32 * 1024 * 1024),
        cost_estimate=cost,
    )(wbig, wmax_all, lc_fold, xflat, mask)

    # flat position p = i*Wp + j -> output (i, j); drop padded lanes/columns.
    return out_flat[:, :, :Lc].reshape(B, OC, H, Wp)[:, :, :, :W]


def reference_forward(x, w_dil, w_ero, lc_weight, beta=20.0):
    """Pure-JAX reference mirroring the PyTorch MorphBlock2D forward."""
    B, C, H, W = x.shape
    n_dil, _, k, _ = w_dil.shape
    n_ero = w_ero.shape[0]
    OC = lc_weight.shape[1]
    pad_b = (k - 1) // 2
    pad_e = (k - 1) - pad_b

    xpd = jnp.pad(x, ((0, 0), (0, 0), (pad_b, pad_e), (pad_b, pad_e)),
                  constant_values=float('-inf'))
    xpe = jnp.pad(x, ((0, 0), (0, 0), (pad_b, pad_e), (pad_b, pad_e)),
                  constant_values=float('inf'))

    def patches(xp):
        rows = []
        for ki in range(k):
            cols = []
            for kj in range(k):
                cols.append(xp[:, :, ki:ki + H, kj:kj + W])
            rows.append(jnp.stack(cols, axis=2))
        return jnp.stack(rows, axis=2)  # (B, C, k, k, H, W)

    pd = patches(xpd)
    pe_ = patches(xpe)

    td = beta * (w_dil[None, :, :, :, :, None, None] + pd[:, None])
    dil = jax.nn.logsumexp(td.reshape(B, n_dil, -1, H, W), axis=2) / beta

    te = beta * (w_ero[None, :, :, :, :, None, None] - pe_[:, None])
    ero = -jax.nn.logsumexp(te.reshape(B, n_ero, -1, H, W), axis=2) / beta

    cat = jnp.concatenate([dil, ero], axis=1)          # (B, n_dil+n_ero, H, W)
    lc = lc_weight.reshape(OC, n_dil + n_ero)
    return jnp.einsum('oc,bchw->bohw', lc, cat)


if __name__ == "__main__":
    # MorphBlock2D(in_channels=4, out_channels=4, nMorphOp=2, kernel_size=3)
    # (n_dil + n_ero must equal in_channels for the lc_weight broadcast.)
    B, C, H, W = 2, 4, 16, 16
    n_morph = 2
    n_dil, n_ero = n_morph, n_morph
    OC = 4
    ksz = 3
    beta = 20.0

    key = jax.random.PRNGKey(0)
    k1, k2, k3, kx = jax.random.split(key, 4)

    # kaiming_uniform_(a=sqrt(5)) -> bound = 1/sqrt(fan_in)
    bound_w = 1.0 / math.sqrt(C * ksz * ksz)
    w_dil = jax.random.uniform(k1, (n_dil, C, ksz, ksz), jnp.float32,
                               minval=-bound_w, maxval=bound_w)
    w_ero = jax.random.uniform(k2, (n_ero, C, ksz, ksz), jnp.float32,
                               minval=-bound_w, maxval=bound_w)
    bound_lc = 1.0 / math.sqrt(OC * C)
    lc_weight = jax.random.uniform(k3, (1, OC, C, 1, 1), jnp.float32,
                                   minval=-bound_lc, maxval=bound_lc)

    x = jax.random.normal(kx, (B, C, H, W), jnp.float32)

    out = jax.block_until_ready(
        morph_block_2d(x, w_dil, w_ero, lc_weight, beta=beta))
    ref = reference_forward(x, w_dil, w_ero, lc_weight, beta=beta)

    assert out.shape == (B, OC, H, W)
    err = jnp.max(jnp.abs(out - ref))
    assert jnp.allclose(out, ref, rtol=1e-4, atol=2e-4), \
        f"mismatch: max abs err {err}"

    print("KERNEL_OK")
</pallas_src>

<mosaic_0001>
module attributes {stable_mosaic.version = 11 : i64} {
  func.func @_morph_kernel(%arg0: i32, %arg1: memref<8x144xf32, #tpu.memory_space<vmem>>, %arg2: memref<8x1xf32, #tpu.memory_space<vmem>>, %arg3: memref<4x4xf32, #tpu.memory_space<vmem>>, %arg4: memref<1x8x512xf32, #tpu.memory_space<vmem>>, %arg5: memref<1x512xf32, #tpu.memory_space<vmem>>, %arg6: memref<2x4x384xf32, #tpu.memory_space<vmem>>, %arg7: memref<144x384xf32, #tpu.memory_space<vmem>>) attributes {dimension_semantics = [#tpu.dimension_semantics<parallel>], iteration_bounds = array<i64: 1>, scalar_prefetch = 0 : i64, scratch_operands = 1 : i64, tpu.core_type = #tpu.core_type<tc>, window_params = [{pipeline_mode = #tpu.pipeline_mode<synchronous>, transform_indices = @transform_0, window_bounds = array<i64: 8, 144>}, {pipeline_mode = #tpu.pipeline_mode<synchronous>, transform_indices = @transform_1, window_bounds = array<i64: 8, 1>}, {pipeline_mode = #tpu.pipeline_mode<synchronous>, transform_indices = @transform_2, window_bounds = array<i64: 4, 4>}, {transform_indices = @transform_3, window_bounds = array<i64: 1, 8, 512>}, {pipeline_mode = #tpu.pipeline_mode<synchronous>, transform_indices = @transform_4, window_bounds = array<i64: 1, 512>}, {transform_indices = @transform_5, window_bounds = array<i64: 2, 4, 384>}]} {
    %c0 = arith.constant 0 : index
    %c0_0 = arith.constant 0 : index
    %c0_1 = arith.constant 0 : index
    %0 = vector.load %arg4[%c0, %c0_0, %c0_1] : memref<1x8x512xf32, #tpu.memory_space<vmem>>, vector<1x8x512xf32>
    %1 = vector.shape_cast %0 : vector<1x8x512xf32> to vector<8x512xf32>
    %cst = arith.constant 2.000000e+01 : f32
    %2 = vector.broadcast %cst : f32 to vector<8x512xf32>
    %3 = arith.mulf %1, %2 : vector<8x512xf32>
    %c0_2 = arith.constant 0 : index
    %c0_3 = arith.constant 0 : index
    %4 = vector.load %arg5[%c0_2, %c0_3] : memref<1x512xf32, #tpu.memory_space<vmem>>, vector<1x512xf32>
    %5 = vector.extract_strided_slice %3 {offsets = [0, 0], sizes = [8, 384], strides = [1, 1]} : vector<8x512xf32> to vector<8x384xf32>
    %6 = vector.extract_strided_slice %4 {offsets = [0, 0], sizes = [1, 384], strides = [1, 1]} : vector<1x512xf32> to vector<1x384xf32>
    %7 = vector.broadcast %6 : vector<1x384xf32> to vector<8x384xf32>
    %8 = arith.addf %5, %7 : vector<8x384xf32>
    %9 = vector.broadcast %6 : vector<1x384xf32> to vector<8x384xf32>
    %10 = arith.subf %9, %5 : vector<8x384xf32>
    %c0_4 = arith.constant 0 : index
    %c0_5 = arith.constant 0 : index
    %11 = vector.load %arg7[%c0_4, %c0_5] : memref<144x384xf32, #tpu.memory_space<vmem>>, vector<8x384xf32>
    tpu.vector_store %arg7[%c0_4, %c0_5], %8 {strides = array<i32>} : memref<144x384xf32, #tpu.memory_space<vmem>>, vector<8x384xf32>,
    %12 = vector.extract_strided_slice %3 {offsets = [0, 1], sizes = [8, 384], strides = [1, 1]} : vector<8x512xf32> to vector<8x384xf32>
    %13 = vector.extract_strided_slice %4 {offsets = [0, 1], sizes = [1, 384], strides = [1, 1]} : vector<1x512xf32> to vector<1x384xf32>
    %14 = vector.broadcast %13 : vector<1x384xf32> to vector<8x384xf32>
    %15 = arith.addf %12, %14 : vector<8x384xf32>
    %16 = vector.broadcast %13 : vector<1x384xf32> to vector<8x384xf32>
    %17 = arith.subf %16, %12 : vector<8x384xf32>
    %c8 = arith.constant 8 : index
    %c0_6 = arith.constant 0 : index
    %18 = vector.load %arg7[%c8, %c0_6] : memref<144x384xf32, #tpu.memory_space<vmem>>, vector<8x384xf32>
    tpu.vector_store %arg7[%c8, %c0_6], %15 {strides = array<i32>} : memref<144x384xf32, #tpu.memory_space<vmem>>, vector<8x384xf32>,
    %19 = arith.maximumf %8, %15 : vector<8x384xf32>
    %20 = arith.maximumf %10, %17 : vector<8x384xf32>
    %21 = vector.extract_strided_slice %3 {offsets = [0, 2], sizes = [8, 384], strides = [1, 1]} : vector<8x512xf32> to vector<8x384xf32>
    %22 = vector.extract_strided_slice %4 {offsets = [0, 2], sizes = [1, 384], strides = [1, 1]} : vector<1x512xf32> to vector<1x384xf32>
    %23 = vector.broadcast %22 : vector<1x384xf32> to vector<8x384xf32>
    %24 = arith.addf %21, %23 : vector<8x384xf32>
    %25 = vector.broadcast %22 : vector<1x384xf32> to vector<8x384xf32>
    %26 = arith.subf %25, %21 : vector<8x384xf32>
    %c16 = arith.constant 16 : index
    %c0_7 = arith.constant 0 : index
    %27 = vector.load %arg7[%c16, %c0_7] : memref<144x384xf32, #tpu.memory_space<vmem>>, vector<8x384xf32>
    tpu.vector_store %arg7[%c16, %c0_7], %24 {strides = array<i32>} : memref<144x384xf32, #tpu.memory_space<vmem>>, vector<8x384xf32>,
    %28 = arith.maximumf %19, %24 : vector<8x384xf32>
    %29 = arith.maximumf %20, %26 : vector<8x384xf32>
    %30 = vector.extract_strided_slice %3 {offsets = [0, 18], sizes = [8, 384], strides = [1, 1]} : vector<8x512xf32> to vector<8x384xf32>
    %31 = vector.extract_strided_slice %4 {offsets = [0, 18], sizes = [1, 384], strides = [1, 1]} : vector<1x512xf32> to vector<1x384xf32>
    %32 = vector.broadcast %31 : vector<1x384xf32> to vector<8x384xf32>
    %33 = arith.addf %30, %32 : vector<8x384xf32>
    %34 = vector.broadcast %31 : vector<1x384xf32> to vector<8x384xf32>
    %35 = arith.subf %34, %30 : vector<8x384xf32>
    %c24 = arith.constant 24 : index
    %c0_8 = arith.constant 0 : index
    %36 = vector.load %arg7[%c24, %c0_8] : memref<144x384xf32, #tpu.memory_space<vmem>>, vector<8x384xf32>
    tpu.vector_store %arg7[%c24, %c0_8], %33 {strides = array<i32>} : memref<144x384xf32, #tpu.memory_space<vmem>>, vector<8x384xf32>,
    %37 = arith.maximumf %28, %33 : vector<8x384xf32>
    %38 = arith.maximumf %29, %35 : vector<8x384xf32>
    %39 = vector.extract_strided_slice %3 {offsets = [0, 19], sizes = [8, 384], strides = [1, 1]} : vector<8x512xf32> to vector<8x384xf32>
    %40 = vector.extract_strided_slice %4 {offsets = [0, 19], sizes = [1, 384], strides = [1, 1]} : vector<1x512xf32> to vector<1x384xf32>
    %41 = vector.broadcast %40 : vector<1x384xf32> to vector<8x384xf32>
    %42 = arith.addf %39, %41 : vector<8x384xf32>
    %43 = vector.broadcast %40 : vector<1x384xf32> to vector<8x384xf32>
    %44 = arith.subf %43, %39 : vector<8x384xf32>
    %c32 = arith.constant 32 : index
    %c0_9 = arith.constant 0 : index
    %45 = vector.load %arg7[%c32, %c0_9] : memref<144x384xf32, #tpu.memory_space<vmem>>, vector<8x384xf32>
    tpu.vector_store %arg7[%c32, %c0_9], %42 {strides = array<i32>} : memref<144x384xf32, #tpu.memory_space<vmem>>, vector<8x384xf32>,
    %46 = arith.maximumf %37, %42 : vector<8x384xf32>
    %47 = arith.maximumf %38, %44 : vector<8x384xf32>
    %48 = vector.extract_strided_slice %3 {offsets = [0, 20], sizes = [8, 384], strides = [1, 1]} : vector<8x512xf32> to vector<8x384xf32>
    %49 = vector.extract_strided_slice %4 {offsets = [0, 20], sizes = [1, 384], strides = [1, 1]} : vector<1x512xf32> to vector<1x384xf32>
    %50 = vector.broadcast %49 : vector<1x384xf32> to vector<8x384xf32>
    %51 = arith.addf %48, %50 : vector<8x384xf32>
    %52 = vector.broadcast %49 : vector<1x384xf32> to vector<8x384xf32>
    %53 = arith.subf %52, %48 : vector<8x384xf32>
    %c40 = arith.constant 40 : index
    %c0_10 = arith.constant 0 : index
    %54 = vector.load %arg7[%c40, %c0_10] : memref<144x384xf32, #tpu.memory_space<vmem>>, vector<8x384xf32>
    tpu.vector_store %arg7[%c40, %c0_10], %51 {strides = array<i32>} : memref<144x384xf32, #tpu.memory_space<vmem>>, vector<8x384xf32>,
    %55 = arith.maximumf %46, %51 : vector<8x384xf32>
    %56 = arith.maximumf %47, %53 : vector<8x384xf32>
    %57 = vector.extract_strided_slice %3 {offsets = [0, 36], sizes = [8, 384], strides = [1, 1]} : vector<8x512xf32> to vector<8x384xf32>
    %58 = vector.extract_strided_slice %4 {offsets = [0, 36], sizes = [1, 384], strides = [1, 1]} : vector<1x512xf32> to vector<1x384xf32>
    %59 = vector.broadcast %58 : vector<1x384xf32> to vector<8x384xf32>
    %60 = arith.addf %57, %59 : vector<8x384xf32>
    %61 = vector.broadcast %58 : vector<1x384xf32> to vector<8x384xf32>
    %62 = arith.subf %61, %57 : vector<8x384xf32>
    %c48 = arith.constant 48 : index
    %c0_11 = arith.constant 0 : index
    %63 = vector.load %arg7[%c48, %c0_11] : memref<144x384xf32, #tpu.memory_space<vmem>>, vector<8x384xf32>
    tpu.vector_store %arg7[%c48, %c0_11], %60 {strides = array<i32>} : memref<144x384xf32, #tpu.memory_space<vmem>>, vector<8x384xf32>,
    %64 = arith.maximumf %55, %60 : vector<8x384xf32>
    %65 = arith.maximumf %56, %62 : vector<8x384xf32>
    %66 = vector.extract_strided_slice %3 {offsets = [0, 37], sizes = [8, 384], strides = [1, 1]} : vector<8x512xf32> to vector<8x384xf32>
    %67 = vector.extract_strided_slice %4 {offsets = [0, 37], sizes = [1, 384], strides = [1, 1]} : vector<1x512xf32> to vector<1x384xf32>
    %68 = vector.broadcast %67 : vector<1x384xf32> to vector<8x384xf32>
    %69 = arith.addf %66, %68 : vector<8x384xf32>
    %70 = vector.broadcast %67 : vector<1x384xf32> to vector<8x384xf32>
    %71 = arith.subf %70, %66 : vector<8x384xf32>
    %c56 = arith.constant 56 : index
    %c0_12 = arith.constant 0 : index
    %72 = vector.load %arg7[%c56, %c0_12] : memref<144x384xf32, #tpu.memory_space<vmem>>, vector<8x384xf32>
    tpu.vector_store %arg7[%c56, %c0_12], %69 {strides = array<i32>} : memref<144x384xf32, #tpu.memory_space<vmem>>, vector<8x384xf32>,
    %73 = arith.maximumf %64, %69 : vector<8x384xf32>
    %74 = arith.maximumf %65, %71 : vector<8x384xf32>
    %75 = vector.extract_strided_slice %3 {offsets = [0, 38], sizes = [8, 384], strides = [1, 1]} : vector<8x512xf32> to vector<8x384xf32>
    %76 = vector.extract_strided_slice %4 {offsets = [0, 38], sizes = [1, 384], strides = [1, 1]} : vector<1x512xf32> to vector<1x384xf32>
    %77 = vector.broadcast %76 : vector<1x384xf32> to vector<8x384xf32>
    %78 = arith.addf %75, %77 : vector<8x384xf32>
    %79 = vector.broadcast %76 : vector<1x384xf32> to vector<8x384xf32>
    %80 = arith.subf %79, %75 : vector<8x384xf32>
    %c64 = arith.constant 64 : index
    %c0_13 = arith.constant 0 : index
    %81 = vector.load %arg7[%c64, %c0_13] : memref<144x384xf32, #tpu.memory_space<vmem>>, vector<8x384xf32>
    tpu.vector_store %arg7[%c64, %c0_13], %78 {strides = array<i32>} : memref<144x384xf32, #tpu.memory_space<vmem>>, vector<8x384xf32>,
    %82 = arith.maximumf %73, %78 : vector<8x384xf32>
    %83 = arith.maximumf %74, %80 : vector<8x384xf32>
    %84 = vector.extract_strided_slice %82 {offsets = [0, 0], sizes = [4, 384], strides = [1, 1]} : vector<8x384xf32> to vector<4x384xf32>
    %cst_14 = arith.constant dense<0xFF800000> : vector<384xf32>
    %85 = vector.multi_reduction <maximumf>, %84, %cst_14 [0] : vector<4x384xf32> to vector<384xf32>
    %86 = vector.shape_cast %85 : vector<384xf32> to vector<1x384xf32>
    %87 = vector.extract_strided_slice %82 {offsets = [4, 0], sizes = [4, 384], strides = [1, 1]} : vector<8x384xf32> to vector<4x384xf32>
    %cst_15 = arith.constant dense<0xFF800000> : vector<384xf32>
    %88 = vector.multi_reduction <maximumf>, %87, %cst_15 [0] : vector<4x384xf32> to vector<384xf32>
    %89 = vector.shape_cast %88 : vector<384xf32> to vector<1x384xf32>
    %90 = vector.extract_strided_slice %83 {offsets = [0, 0], sizes = [4, 384], strides = [1, 1]} : vector<8x384xf32> to vector<4x384xf32>
    %cst_16 = arith.constant dense<0xFF800000> : vector<384xf32>
    %91 = vector.multi_reduction <maximumf>, %90, %cst_16 [0] : vector<4x384xf32> to vector<384xf32>
    %92 = vector.shape_cast %91 : vector<384xf32> to vector<1x384xf32>
    %93 = vector.extract_strided_slice %83 {offsets = [4, 0], sizes = [4, 384], strides = [1, 1]} : vector<8x384xf32> to vector<4x384xf32>
    %cst_17 = arith.constant dense<0xFF800000> : vector<384xf32>
    %94 = vector.multi_reduction <maximumf>, %93, %cst_17 [0] : vector<4x384xf32> to vector<384xf32>
    %95 = vector.shape_cast %94 : vector<384xf32> to vector<1x384xf32>
    %96 = vector.shape_cast %86 : vector<1x384xf32> to vector<1x384xf32>
    %97 = vector.broadcast %96 : vector<1x384xf32> to vector<4x384xf32>
    %98 = vector.shape_cast %89 : vector<1x384xf32> to vector<1x384xf32>
    %99 = vector.broadcast %98 : vector<1x384xf32> to vector<4x384xf32>
    %100 = tpu.concatenate %97, %99 in 0 : vector<4x384xf32>, vector<4x384xf32> -> vector<8x384xf32>
    %101 = vector.shape_cast %92 : vector<1x384xf32> to vector<1x384xf32>
    %102 = vector.broadcast %101 : vector<1x384xf32> to vector<4x384xf32>
    %103 = vector.shape_cast %95 : vector<1x384xf32> to vector<1x384xf32>
    %104 = vector.broadcast %103 : vector<1x384xf32> to vector<4x384xf32>
    %105 = tpu.concatenate %102, %104 in 0 : vector<4x384xf32>, vector<4x384xf32> -> vector<8x384xf32>
    %cst_18 = arith.constant 2.000000e+00 : f32
    %106 = vector.broadcast %cst_18 : f32 to vector<1x512xf32>
    %107 = arith.mulf %4, %106 : vector<1x512xf32>
    %c0_19 = arith.constant 0 : index
    %c0_20 = arith.constant 0 : index
    %108 = vector.load %arg7[%c0_19, %c0_20] : memref<144x384xf32, #tpu.memory_space<vmem>>, vector<8x384xf32>
    %109 = arith.subf %108, %100 : vector<8x384xf32>
    %110 = math.exp %109 : vector<8x384xf32>
    %c0_21 = arith.constant 0 : index
    %c0_22 = arith.constant 0 : index
    %111 = vector.load %arg7[%c0_21, %c0_22] : memref<144x384xf32, #tpu.memory_space<vmem>>, vector<8x384xf32>
    tpu.vector_store %arg7[%c0_21, %c0_22], %110 {strides = array<i32>} : memref<144x384xf32, #tpu.memory_space<vmem>>, vector<8x384xf32>,
    %112 = vector.extract_strided_slice %107 {offsets = [0, 0], sizes = [1, 384], strides = [1, 1]} : vector<1x512xf32> to vector<1x384xf32>
    %113 = vector.broadcast %112 : vector<1x384xf32> to vector<8x384xf32>
    %114 = arith.subf %113, %105 : vector<8x384xf32>
    %115 = arith.subf %114, %108 : vector<8x384xf32>
    %116 = math.exp %115 : vector<8x384xf32>
    %c72 = arith.constant 72 : index
    %c0_23 = arith.constant 0 : index
    %117 = vector.load %arg7[%c72, %c0_23] : memref<144x384xf32, #tpu.memory_space<vmem>>, vector<8x384xf32>
    tpu.vector_store %arg7[%c72, %c0_23], %116 {strides = array<i32>} : memref<144x384xf32, #tpu.memory_space<vmem>>, vector<8x384xf32>,
    %c8_24 = arith.constant 8 : index
    %c0_25 = arith.constant 0 : index
    %118 = vector.load %arg7[%c8_24, %c0_25] : memref<144x384xf32, #tpu.memory_space<vmem>>, vector<8x384xf32>
    %119 = arith.subf %118, %100 : vector<8x384xf32>
    %120 = math.exp %119 : vector<8x384xf32>
    %c8_26 = arith.constant 8 : index
    %c0_27 = arith.constant 0 : index
    %121 = vector.load %arg7[%c8_26, %c0_27] : memref<144x384xf32, #tpu.memory_space<vmem>>, vector<8x384xf32>
    tpu.vector_store %arg7[%c8_26, %c0_27], %120 {strides = array<i32>} : memref<144x384xf32, #tpu.memory_space<vmem>>, vector<8x384xf32>,
    %122 = vector.extract_strided_slice %107 {offsets = [0, 1], sizes = [1, 384], strides = [1, 1]} : vector<1x512xf32> to vector<1x384xf32>
    %123 = vector.broadcast %122 : vector<1x384xf32> to vector<8x384xf32>
    %124 = arith.subf %123, %105 : vector<8x384xf32>
    %125 = arith.subf %124, %118 : vector<8x384xf32>
    %126 = math.exp %125 : vector<8x384xf32>
    %c80 = arith.constant 80 : index
    %c0_28 = arith.constant 0 : index
    %127 = vector.load %arg7[%c80, %c0_28] : memref<144x384xf32, #tpu.memory_space<vmem>>, vector<8x384xf32>
    tpu.vector_store %arg7[%c80, %c0_28], %126 {strides = array<i32>} : memref<144x384xf32, #tpu.memory_space<vmem>>, vector<8x384xf32>,
    %c16_29 = arith.constant 16 : index
    %c0_30 = arith.constant 0 : index
    %128 = vector.load %arg7[%c16_29, %c0_30] : memref<144x384xf32, #tpu.memory_space<vmem>>, vector<8x384xf32>
    %129 = arith.subf %128, %100 : vector<8x384xf32>
    %130 = math.exp %129 : vector<8x384xf32>
    %c16_31 = arith.constant 16 : index
    %c0_32 = arith.constant 0 : index
    %131 = vector.load %arg7[%c16_31, %c0_32] : memref<144x384xf32, #tpu.memory_space<vmem>>, vector<8x384xf32>
    tpu.vector_store %arg7[%c16_31, %c0_32], %130 {strides = array<i32>} : memref<144x384xf32, #tpu.memory_space<vmem>>, vector<8x384xf32>,
    %132 = vector.extract_strided_slice %107 {offsets = [0, 2], sizes = [1, 384], strides = [1, 1]} : vector<1x512xf32> to vector<1x384xf32>
    %133 = vector.broadcast %132 : vector<1x384xf32> to vector<8x384xf32>
    %134 = arith.subf %133, %105 : vector<8x384xf32>
    %135 = arith.subf %134, %128 : vector<8x384xf32>
    %136 = math.exp %135 : vector<8x384xf32>
    %c88 = arith.constant 88 : index
    %c0_33 = arith.constant 0 : index
    %137 = vector.load %arg7[%c88, %c0_33] : memref<144x384xf32, #tpu.memory_space<vmem>>, vector<8x384xf32>
    tpu.vector_store %arg7[%c88, %c0_33], %136 {strides = array<i32>} : memref<144x384xf32, #tpu.memory_space<vmem>>, vector<8x384xf32>,
    %c24_34 = arith.constant 24 : index
    %c0_35 = arith.constant 0 : index
    %138 = vector.load %arg7[%c24_34, %c0_35] : memref<144x384xf32, #tpu.memory_space<vmem>>, vector<8x384xf32>
    %139 = arith.subf %138, %100 : vector<8x384xf32>
    %140 = math.exp %139 : vector<8x384xf32>
    %c24_36 = arith.constant 24 : index
    %c0_37 = arith.constant 0 : index
    %141 = vector.load %arg7[%c24_36, %c0_37] : memref<144x384xf32, #tpu.memory_space<vmem>>, vector<8x384xf32>
    tpu.vector_store %arg7[%c24_36, %c0_37], %140 {strides = array<i32>} : memref<144x384xf32, #tpu.memory_space<vmem>>, vector<8x384xf32>,
    %142 = vector.extract_strided_slice %107 {offsets = [0, 18], sizes = [1, 384], strides = [1, 1]} : vector<1x512xf32> to vector<1x384xf32>
    %143 = vector.broadcast %142 : vector<1x384xf32> to vector<8x384xf32>
    %144 = arith.subf %143, %105 : vector<8x384xf32>
    %145 = arith.subf %144, %138 : vector<8x384xf32>
    %146 = math.exp %145 : vector<8x384xf32>
    %c96 = arith.constant 96 : index
    %c0_38 = arith.constant 0 : index
    %147 = vector.load %arg7[%c96, %c0_38] : memref<144x384xf32, #tpu.memory_space<vmem>>, vector<8x384xf32>
    tpu.vector_store %arg7[%c96, %c0_38], %146 {strides = array<i32>} : memref<144x384xf32, #tpu.memory_space<vmem>>, vector<8x384xf32>,
    %c32_39 = arith.constant 32 : index
    %c0_40 = arith.constant 0 : index
    %148 = vector.load %arg7[%c32_39, %c0_40] : memref<144x384xf32, #tpu.memory_space<vmem>>, vector<8x384xf32>
    %149 = arith.subf %148, %100 : vector<8x384xf32>
    %150 = math.exp %149 : vector<8x384xf32>
    %c32_41 = arith.constant 32 : index
    %c0_42 = arith.constant 0 : index
    %151 = vector.load %arg7[%c32_41, %c0_42] : memref<144x384xf32, #tpu.memory_space<vmem>>, vector<8x384xf32>
    tpu.vector_store %arg7[%c32_41, %c0_42], %150 {strides = array<i32>} : memref<144x384xf32, #tpu.memory_space<vmem>>, vector<8x384xf32>,
    %152 = vector.extract_strided_slice %107 {offsets = [0, 19], sizes = [1, 384], strides = [1, 1]} : vector<1x512xf32> to vector<1x384xf32>
    %153 = vector.broadcast %152 : vector<1x384xf32> to vector<8x384xf32>
    %154 = arith.subf %153, %105 : vector<8x384xf32>
    %155 = arith.subf %154, %148 : vector<8x384xf32>
    %156 = math.exp %155 : vector<8x384xf32>
    %c104 = arith.constant 104 : index
    %c0_43 = arith.constant 0 : index
    %157 = vector.load %arg7[%c104, %c0_43] : memref<144x384xf32, #tpu.memory_space<vmem>>, vector<8x384xf32>
    tpu.vector_store %arg7[%c104, %c0_43], %156 {strides = array<i32>} : memref<144x384xf32, #tpu.memory_space<vmem>>, vector<8x384xf32>,
    %c40_44 = arith.constant 40 : index
    %c0_45 = arith.constant 0 : index
    %158 = vector.load %arg7[%c40_44, %c0_45] : memref<144x384xf32, #tpu.memory_space<vmem>>, vector<8x384xf32>
    %159 = arith.subf %158, %100 : vector<8x384xf32>
    %160 = math.exp %159 : vector<8x384xf32>
    %c40_46 = arith.constant 40 : index
    %c0_47 = arith.constant 0 : index
    %161 = vector.load %arg7[%c40_46, %c0_47] : memref<144x384xf32, #tpu.memory_space<vmem>>, vector<8x384xf32>
    tpu.vector_store %arg7[%c40_46, %c0_47], %160 {strides = array<i32>} : memref<144x384xf32, #tpu.memory_space<vmem>>, vector<8x384xf32>,
    %162 = vector.extract_strided_slice %107 {offsets = [0, 20], sizes = [1, 384], strides = [1, 1]} : vector<1x512xf32> to vector<1x384xf32>
    %163 = vector.broadcast %162 : vector<1x384xf32> to vector<8x384xf32>
    %164 = arith.subf %163, %105 : vector<8x384xf32>
    %165 = arith.subf %164, %158 : vector<8x384xf32>
    %166 = math.exp %165 : vector<8x384xf32>
    %c112 = arith.constant 112 : index
    %c0_48 = arith.constant 0 : index
    %167 = vector.load %arg7[%c112, %c0_48] : memref<144x384xf32, #tpu.memory_space<vmem>>, vector<8x384xf32>
    tpu.vector_store %arg7[%c112, %c0_48], %166 {strides = array<i32>} : memref<144x384xf32, #tpu.memory_space<vmem>>, vector<8x384xf32>,
    %c48_49 = arith.constant 48 : index
    %c0_50 = arith.constant 0 : index
    %168 = vector.load %arg7[%c48_49, %c0_50] : memref<144x384xf32, #tpu.memory_space<vmem>>, vector<8x384xf32>
    %169 = arith.subf %168, %100 : vector<8x384xf32>
    %170 = math.exp %169 : vector<8x384xf32>
    %c48_51 = arith.constant 48 : index
    %c0_52 = arith.constant 0 : index
    %171 = vector.load %arg7[%c48_51, %c0_52] : memref<144x384xf32, #tpu.memory_space<vmem>>, vector<8x384xf32>
    tpu.vector_store %arg7[%c48_51, %c0_52], %170 {strides = array<i32>} : memref<144x384xf32, #tpu.memory_space<vmem>>, vector<8x384xf32>,
    %172 = vector.extract_strided_slice %107 {offsets = [0, 36], sizes = [1, 384], strides = [1, 1]} : vector<1x512xf32> to vector<1x384xf32>
    %173 = vector.broadcast %172 : vector<1x384xf32> to vector<8x384xf32>
    %174 = arith.subf %173, %105 : vector<8x384xf32>
    %175 = arith.subf %174, %168 : vector<8x384xf32>
    %176 = math.exp %175 : vector<8x384xf32>
    %c120 = arith.constant 120 : index
    %c0_53 = arith.constant 0 : index
    %177 = vector.load %arg7[%c120, %c0_53] : memref<144x384xf32, #tpu.memory_space<vmem>>, vector<8x384xf32>
    tpu.vector_store %arg7[%c120, %c0_53], %176 {strides = array<i32>} : memref<144x384xf32, #tpu.memory_space<vmem>>, vector<8x384xf32>,
    %c56_54 = arith.constant 56 : index
    %c0_55 = arith.constant 0 : index
    %178 = vector.load %arg7[%c56_54, %c0_55] : memref<144x384xf32, #tpu.memory_space<vmem>>, vector<8x384xf32>
    %179 = arith.subf %178, %100 : vector<8x384xf32>
    %180 = math.exp %179 : vector<8x384xf32>
    %c56_56 = arith.constant 56 : index
    %c0_57 = arith.constant 0 : index
    %181 = vector.load %arg7[%c56_56, %c0_57] : memref<144x384xf32, #tpu.memory_space<vmem>>, vector<8x384xf32>
    tpu.vector_store %arg7[%c56_56, %c0_57], %180 {strides = array<i32>} : memref<144x384xf32, #tpu.memory_space<vmem>>, vector<8x384xf32>,
    %182 = vector.extract_strided_slice %107 {offsets = [0, 37], sizes = [1, 384], strides = [1, 1]} : vector<1x512xf32> to vector<1x384xf32>
    %183 = vector.broadcast %182 : vector<1x384xf32> to vector<8x384xf32>
    %184 = arith.subf %183, %105 : vector<8x384xf32>
    %185 = arith.subf %184, %178 : vector<8x384xf32>
    %186 = math.exp %185 : vector<8x384xf32>
    %c128 = arith.constant 128 : index
    %c0_58 = arith.constant 0 : index
    %187 = vector.load %arg7[%c128, %c0_58] : memref<144x384xf32, #tpu.memory_space<vmem>>, vector<8x384xf32>
    tpu.vector_store %arg7[%c128, %c0_58], %186 {strides = array<i32>} : memref<144x384xf32, #tpu.memory_space<vmem>>, vector<8x384xf32>,
    %c64_59 = arith.constant 64 : index
    %c0_60 = arith.constant 0 : index
    %188 = vector.load %arg7[%c64_59, %c0_60] : memref<144x384xf32, #tpu.memory_space<vmem>>, vector<8x384xf32>
    %189 = arith.subf %188, %100 : vector<8x384xf32>
    %190 = math.exp %189 : vector<8x384xf32>
    %c64_61 = arith.constant 64 : index
    %c0_62 = arith.constant 0 : index
    %191 = vector.load %arg7[%c64_61, %c0_62] : memref<144x384xf32, #tpu.memory_space<vmem>>, vector<8x384xf32>
    tpu.vector_store %arg7[%c64_61, %c0_62], %190 {strides = array<i32>} : memref<144x384xf32, #tpu.memory_space<vmem>>, vector<8x384xf32>,
    %192 = vector.extract_strided_slice %107 {offsets = [0, 38], sizes = [1, 384], strides = [1, 1]} : vector<1x512xf32> to vector<1x384xf32>
    %193 = vector.broadcast %192 : vector<1x384xf32> to vector<8x384xf32>
    %194 = arith.subf %193, %105 : vector<8x384xf32>
    %195 = arith.subf %194, %188 : vector<8x384xf32>
    %196 = math.exp %195 : vector<8x384xf32>
    %c136 = arith.constant 136 : index
    %c0_63 = arith.constant 0 : index
    %197 = vector.load %arg7[%c136, %c0_63] : memref<144x384xf32, #tpu.memory_space<vmem>>, vector<8x384xf32>
    tpu.vector_store %arg7[%c136, %c0_63], %196 {strides = array<i32>} : memref<144x384xf32, #tpu.memory_space<vmem>>, vector<8x384xf32>,
    %c0_64 = arith.constant 0 : index
    %c0_65 = arith.constant 0 : index
    %198 = vector.load %arg1[%c0_64, %c0_65] : memref<8x144xf32, #tpu.memory_space<vmem>>, vector<8x144xf32>
    %c0_66 = arith.constant 0 : index
    %c0_67 = arith.constant 0 : index
    %199 = vector.load %arg7[%c0_66, %c0_67] : memref<144x384xf32, #tpu.memory_space<vmem>>, vector<144x384xf32>
    %cst_68 = arith.constant dense<0.000000e+00> : vector<8x384xf32>
    %200 = tpu.matmul %198, %199, %cst_68 {dimension_numbers = #tpu.dot_dimension_numbers<[1], [0], [0], [1], [0, 0, 1, 1], [], []>} : vector<8x144xf32>, vector<144x384xf32>, vector<8x384xf32> -> vector<8x384xf32>
    %201 = math.log %200 : vector<8x384xf32>
    %c0_69 = arith.constant 0 : index
    %c0_70 = arith.constant 0 : index
    %202 = vector.load %arg2[%c0_69, %c0_70] : memref<8x1xf32, #tpu.memory_space<vmem>>, vector<8x1xf32>
    %203 = vector.broadcast %202 : vector<8x1xf32> to vector<8x384xf32>
    %204 = arith.addf %201, %203 : vector<8x384xf32>
    %c0_71 = arith.constant 0 : index
    %c0_72 = arith.constant 0 : index
    %205 = vector.load %arg3[%c0_71, %c0_72] : memref<4x4xf32, #tpu.memory_space<vmem>>, vector<4x4xf32>
    %206 = vector.extract_strided_slice %204 {offsets = [0, 0], sizes = [2, 384], strides = [1, 1]} : vector<8x384xf32> to vector<2x384xf32>
    %207 = vector.broadcast %86 : vector<1x384xf32> to vector<2x384xf32>
    %208 = arith.addf %206, %207 : vector<2x384xf32>
    %209 = vector.extract_strided_slice %204 {offsets = [2, 0], sizes = [2, 384], strides = [1, 1]} : vector<8x384xf32> to vector<2x384xf32>
    %210 = vector.broadcast %92 : vector<1x384xf32> to vector<2x384xf32>
    %211 = arith.addf %209, %210 : vector<2x384xf32>
    %212 = tpu.concatenate %208, %211 in 0 : vector<2x384xf32>, vector<2x384xf32> -> vector<4x384xf32>
    %213 = vector.extract_strided_slice %205 {offsets = [0, 0], sizes = [4, 1], strides = [1, 1]} : vector<4x4xf32> to vector<4x1xf32>
    %214 = vector.extract_strided_slice %212 {offsets = [0, 0], sizes = [1, 384], strides = [1, 1]} : vector<4x384xf32> to vector<1x384xf32>
    %215 = vector.broadcast %213 : vector<4x1xf32> to vector<4x384xf32>
    %216 = vector.broadcast %214 : vector<1x384xf32> to vector<4x384xf32>
    %217 = arith.mulf %215, %216 : vector<4x384xf32>
    %218 = vector.extract_strided_slice %205 {offsets = [0, 1], sizes = [4, 1], strides = [1, 1]} : vector<4x4xf32> to vector<4x1xf32>
    %219 = vector.extract_strided_slice %212 {offsets = [1, 0], sizes = [1, 384], strides = [1, 1]} : vector<4x384xf32> to vector<1x384xf32>
    %220 = vector.broadcast %218 : vector<4x1xf32> to vector<4x384xf32>
    %221 = vector.broadcast %219 : vector<1x384xf32> to vector<4x384xf32>
    %222 = arith.mulf %220, %221 : vector<4x384xf32>
    %223 = arith.addf %217, %222 : vector<4x384xf32>
    %224 = vector.extract_strided_slice %205 {offsets = [0, 2], sizes = [4, 1], strides = [1, 1]} : vector<4x4xf32> to vector<4x1xf32>
    %225 = vector.extract_strided_slice %212 {offsets = [2, 0], sizes = [1, 384], strides = [1, 1]} : vector<4x384xf32> to vector<1x384xf32>
    %226 = vector.broadcast %224 : vector<4x1xf32> to vector<4x384xf32>
    %227 = vector.broadcast %225 : vector<1x384xf32> to vector<4x384xf32>
    %228 = arith.mulf %226, %227 : vector<4x384xf32>
    %229 = arith.addf %223, %228 : vector<4x384xf32>
    %230 = vector.extract_strided_slice %205 {offsets = [0, 3], sizes = [4, 1], strides = [1, 1]} : vector<4x4xf32> to vector<4x1xf32>
    %231 = vector.extract_strided_slice %212 {offsets = [3, 0], sizes = [1, 384], strides = [1, 1]} : vector<4x384xf32> to vector<1x384xf32>
    %232 = vector.broadcast %230 : vector<4x1xf32> to vector<4x384xf32>
    %233 = vector.broadcast %231 : vector<1x384xf32> to vector<4x384xf32>
    %234 = arith.mulf %232, %233 : vector<4x384xf32>
    %235 = arith.addf %229, %234 : vector<4x384xf32>
    %c0_73 = arith.constant 0 : index
    %c0_74 = arith.constant 0 : index
    %c0_75 = arith.constant 0 : index
    %236 = vector.load %arg6[%c0_73, %c0_74, %c0_75] : memref<2x4x384xf32, #tpu.memory_space<vmem>>, vector<1x4x384xf32>
    %237 = vector.shape_cast %236 : vector<1x4x384xf32> to vector<4x384xf32>
    %238 = vector.shape_cast %235 : vector<4x384xf32> to vector<1x4x384xf32>
    tpu.vector_store %arg6[%c0_73, %c0_74, %c0_75], %238 {strides = array<i32>} : memref<2x4x384xf32, #tpu.memory_space<vmem>>, vector<1x4x384xf32>,
    %239 = vector.extract_strided_slice %204 {offsets = [4, 0], sizes = [2, 384], strides = [1, 1]} : vector<8x384xf32> to vector<2x384xf32>
    %240 = vector.broadcast %89 : vector<1x384xf32> to vector<2x384xf32>
    %241 = arith.addf %239, %240 : vector<2x384xf32>
    %242 = vector.extract_strided_slice %204 {offsets = [6, 0], sizes = [2, 384], strides = [1, 1]} : vector<8x384xf32> to vector<2x384xf32>
    %243 = vector.broadcast %95 : vector<1x384xf32> to vector<2x384xf32>
    %244 = arith.addf %242, %243 : vector<2x384xf32>
    %245 = tpu.concatenate %241, %244 in 0 : vector<2x384xf32>, vector<2x384xf32> -> vector<4x384xf32>
    %246 = vector.extract_strided_slice %205 {offsets = [0, 0], sizes = [4, 1], strides = [1, 1]} : vector<4x4xf32> to vector<4x1xf32>
    %247 = vector.extract_strided_slice %245 {offsets = [0, 0], sizes = [1, 384], strides = [1, 1]} : vector<4x384xf32> to vector<1x384xf32>
    %248 = vector.broadcast %246 : vector<4x1xf32> to vector<4x384xf32>
    %249 = vector.broadcast %247 : vector<1x384xf32> to vector<4x384xf32>
    %250 = arith.mulf %248, %249 : vector<4x384xf32>
    %251 = vector.extract_strided_slice %205 {offsets = [0, 1], sizes = [4, 1], strides = [1, 1]} : vector<4x4xf32> to vector<4x1xf32>
    %252 = vector.extract_strided_slice %245 {offsets = [1, 0], sizes = [1, 384], strides = [1, 1]} : vector<4x384xf32> to vector<1x384xf32>
    %253 = vector.broadcast %251 : vector<4x1xf32> to vector<4x384xf32>
    %254 = vector.broadcast %252 : vector<1x384xf32> to vector<4x384xf32>
    %255 = arith.mulf %253, %254 : vector<4x384xf32>
    %256 = arith.addf %250, %255 : vector<4x384xf32>
    %257 = vector.extract_strided_slice %205 {offsets = [0, 2], sizes = [4, 1], strides = [1, 1]} : vector<4x4xf32> to vector<4x1xf32>
    %258 = vector.extract_strided_slice %245 {offsets = [2, 0], sizes = [1, 384], strides = [1, 1]} : vector<4x384xf32> to vector<1x384xf32>
    %259 = vector.broadcast %257 : vector<4x1xf32> to vector<4x384xf32>
    %260 = vector.broadcast %258 : vector<1x384xf32> to vector<4x384xf32>
    %261 = arith.mulf %259, %260 : vector<4x384xf32>
    %262 = arith.addf %256, %261 : vector<4x384xf32>
    %263 = vector.extract_strided_slice %205 {offsets = [0, 3], sizes = [4, 1], strides = [1, 1]} : vector<4x4xf32> to vector<4x1xf32>
    %264 = vector.extract_strided_slice %245 {offsets = [3, 0], sizes = [1, 384], strides = [1, 1]} : vector<4x384xf32> to vector<1x384xf32>
    %265 = vector.broadcast %263 : vector<4x1xf32> to vector<4x384xf32>
    %266 = vector.broadcast %264 : vector<1x384xf32> to vector<4x384xf32>
    %267 = arith.mulf %265, %266 : vector<4x384xf32>
    %268 = arith.addf %262, %267 : vector<4x384xf32>
    %c1 = arith.constant 1 : index
    %c0_76 = arith.constant 0 : index
    %c0_77 = arith.constant 0 : index
    %269 = vector.load %arg6[%c1, %c0_76, %c0_77] : memref<2x4x384xf32, #tpu.memory_space<vmem>>, vector<1x4x384xf32>
    %270 = vector.shape_cast %269 : vector<1x4x384xf32> to vector<4x384xf32>
    %271 = vector.shape_cast %268 : vector<4x384xf32> to vector<1x4x384xf32>
    tpu.vector_store %arg6[%c1, %c0_76, %c0_77], %271 {strides = array<i32>} : memref<2x4x384xf32, #tpu.memory_space<vmem>>, vector<1x4x384xf32>,
    return
  }
  func.func @transform_0(%arg0: i32) -> (i32, i32) {
    %c0_i32 = arith.constant 0 : i32
    %c0_i32_0 = arith.constant 0 : i32
    %c0_i32_1 = arith.constant 0 : i32
    return %c0_i32, %c0_i32_0 : i32, i32
  }
  func.func @transform_1(%arg0: i32) -> (i32, i32) {
    %c0_i32 = arith.constant 0 : i32
    %c0_i32_0 = arith.constant 0 : i32
    %c0_i32_1 = arith.constant 0 : i32
    return %c0_i32, %c0_i32_0 : i32, i32
  }
  func.func @transform_2(%arg0: i32) -> (i32, i32) {
    %c0_i32 = arith.constant 0 : i32
    %c0_i32_0 = arith.constant 0 : i32
    %c0_i32_1 = arith.constant 0 : i32
    return %c0_i32, %c0_i32_0 : i32, i32
  }
  func.func @transform_3(%arg0: i32) -> (i32, i32, i32) {
    %c0_i32 = arith.constant 0 : i32
    %c0_i32_0 = arith.constant 0 : i32
    %c0_i32_1 = arith.constant 0 : i32
    return %arg0, %c0_i32, %c0_i32_0 : i32, i32, i32
  }
  func.func @transform_4(%arg0: i32) -> (i32, i32) {
    %c0_i32 = arith.constant 0 : i32
    %c0_i32_0 = arith.constant 0 : i32
    %c0_i32_1 = arith.constant 0 : i32
    return %c0_i32, %c0_i32_0 : i32, i32
  }
  func.func @transform_5(%arg0: i32) -> (i32, i32, i32) {
    %c0_i32 = arith.constant 0 : i32
    %c0_i32_0 = arith.constant 0 : i32
    %c0_i32_1 = arith.constant 0 : i32
    return %arg0, %c0_i32, %c0_i32_0 : i32, i32, i32
  }
}

</mosaic_0001>

<bundles_post_ra>
// kernel: tpu_custom_call.1
= control target key start
LH: loop header
LB: loop body
LE: loop exit
PB: predicated region body
PF: predicated region fallthrough
CT: control target
= control target key end

     0   :  { %10 = vsyncpa [#allocation4], 0  ;;  %s2802_s0 = inlined_call_operand.hbm [shape: f32[8,144], index: 0, kind: input, shape index: {}]   ;;  %s2803_s1 = inlined_call_operand.vmem [shape: f32[8,1], index: 1, kind: input, shape index: {}]   ;;  %s2804_s2 = inlined_call_operand.vmem [shape: f32[4,4], index: 2, kind: input, shape index: {}]   ;;  %s2805_s3 = inlined_call_operand.hbm [shape: f32[1,8,512], index: 3, kind: input, shape index: {}]   ;;  %s2806_s4 = inlined_call_operand.vmem [shape: f32[1,512], index: 4, kind: input, shape index: {}]   ;;  %s2807_s5 = inlined_call_operand.hbm [shape: f32[2,4,384], index: 5, kind: output, shape index: {}]  }
   0x1   :  { %11 = vsyncpa [#allocation7], 0 }
   0x2   :  { %12 = vsyncpa [#allocation5], 0  ;;  %s1855_s18 = smov [#allocation3]   ;;  %s1856_s20 = smov [#allocation6]  }
   0x3   :  { %s19_s19 = sshll.u32 %s1855_s18, 4  ;;  %s33_s21 = sshll.u32 %s1856_s20, 4  ;;  %s20_s19 = int_to_ptr.vmem [resolvable:$true] %s19_s19  ;;  %s34_s21 = int_to_ptr.vmem [resolvable:$true] %s33_s21 }
   0x4   :  { %s1797_s22 = scalar_lea.vmem %s20_s19, 256  ;;  %p1802_p1 = scmp.lt.s32.totalorder %s20_s19, %s20_s19 }
   0x5   :  { %p1798_p0 = scmp.ne.s32.totalorder %s20_s19, %s1797_s22  ;;  %p1803_p2 = scmp.lt.s32.totalorder %s1797_s22, %s1797_s22 }
   0x7   :  { %p1804_p3 = por %p1803_p2, %p1802_p1 }
   0x9   :  { %p1805_p4 = pnand %p1804_p3, %p1798_p0 }
   0xb   :  { %1808 = shalt.err (!%p1805_p4)
}
   0xc   :  { %22 = dma.hbm_to_vmem [thread:$0]  %s2802_s0, 256, %s20_s19, [#allocation4]  }
   0xd   :  { %s1817_s25 = scalar_lea.vmem %s34_s21, 512  ;;  %p1822_p6 = scmp.lt.s32.totalorder %s34_s21, %s34_s21 }
   0xe   :  { %p1818_p5 = scmp.ne.s32.totalorder %s34_s21, %s1817_s25  ;;  %p1823_p7 = scmp.lt.s32.totalorder %s1817_s25, %s1817_s25 }
  0x10   :  { %p1824_p8 = por %p1823_p7, %p1822_p6 }
  0x12   :  { %p1825_p9 = pnand %p1824_p8, %p1818_p5 }
  0x14   :  { %1828 = shalt.err (!%p1825_p9)
}
  0x15   :  { %36 = dma.hbm_to_vmem [thread:$0]  %s2805_s3, 512, %s34_s21, [#allocation7]  }
  0x16   :  { %1849 = dma.done.wait [#allocation4], 256  }
  0x17   :  { %1850 = vsyncadd [#allocation4], 4294967040 }
  0x18   :  { %1851 = dma.done.wait [#allocation7], 512  }
  0x19   :  { %1852 = vsyncadd [#allocation7], 4294966784  ;;  %v55_v0 = vlaneseq  ;;  %v47_v6 = vld [vmem:[#allocation6 + $0x10] sm:$0xff]  ;;  %v45_v8 = vld [vmem:[#allocation6] sm:$0xff]  ;;  %s1857_s3 = smov 127   ;;  %s1859_s29 = smov 110  }
  0x1a   :  { %v1928_v7 = vld [vmem:[%s2806_s4] sm:$0xf]  ;;  %v51_v9 = vmul.f32 20.0, %v47_v6  ;;  %v49_v11 = vmul.f32 20.0, %v45_v8  ;;  %v48_v13 = vld [vmem:[#allocation6 + $0x18] sm:$0xff]  ;;  %v46_v14 = vld [vmem:[#allocation6 + $0x8] sm:$0xff] }
  0x1b   :  { %v56_v1 = vshrl.u32 %v55_v0, 7  ;;  %v52_v15 = vmul.f32 20.0, %v48_v13  ;;  %v50_v17 = vmul.f32 20.0, %v46_v14  ;;  %s1858_s4 = smov 126   ;;  %s1860_s30 = smov 109   ;;  %vm98_vm0 = vcmask 1039360  }
  0x1c   :  { %s1861_s6 = smov 108   ;;  %s1862_s7 = smov 92   ;;  %vm140_vm1 = vcmask 1031168   ;;  %vm178_vm2 = vcmask 900096   ;;  %vm216_vm3 = vcmask 891904   ;;  %vm254_vm4 = vcmask 883712  }
  0x1d   :  { %v1917_v2 = vsub.s32 2, %v56_v1  ;;  %v1919_v3 = vsub.s32 0, %v56_v1  ;;  %v1921_v4 = vsub.s32 3, %v56_v1  ;;  %v1923_v5 = vsub.s32 1, %v56_v1  ;;  %s1863_s8 = smov 91   ;;  %s1864_s9 = smov 90  }
  0x1e   :  { %vm292_vm5 = vcmask 752640   ;;  %vm330_vm6 = vcmask 744448   ;;  %vm368_vm7 = vcmask 736256   ;;  %vm398_vm8 = vcmask 1043456   ;;  %s1865_s10 = smov 36   ;;  %s1866_s11 = smov 20  }
  0x1f   :  { %2835 = vst [vmem:[#allocation12_spill] sm:$0xff] %v1917_v2  ;;  %2836 = vst [vmem:[#allocation13_spill] sm:$0xff] %v1919_v3  ;;  %v66_v10 = vrot.slane %v1928_v7, %v1917_v2  ;;  %v58_v12 = vrot.slane %v1928_v7, %v1919_v3  ;;  %v82_v16 = vrot.slane %v1928_v7, %v1921_v4  ;;  %vm420_vm9 = vcmask 1047556   ;;  %s1867_s12 = smov 19   ;;  %s1868_s13 = smov 18  }
  0x20   :  { %2837 = vst [vmem:[#allocation14_spill] sm:$0xff] %v1921_v4  ;;  %2838 = vst [vmem:[#allocation15_spill] sm:$0xff] %v1923_v5  ;;  %v62_v18 = vrot.slane %v1928_v7, %v1923_v5  ;;  %s1869_s14 = smov 2   ;;  %s1870_s15 = smov 1   ;;  %vm966_vm10 = vcmask 293888   ;;  %vm886_vm11 = vcmask 162816  }
  0x21   :  { %v1938_v19 = vsub.f32 %v66_v10, %v51_v9  ;;  %v1940_v20 = vadd.f32 %v66_v10, %v51_v9  ;;  %v1942_v21 = vsub.f32 %v58_v12, %v49_v11  ;;  %v1944_v22 = vadd.f32 %v58_v12, %v49_v11  ;;  %s1871_s16 = smov 38   ;;  %s1872_s17 = smov 37  }
  0x22   :  { %v1946_v23 = vadd.f32 %v82_v16, %v52_v15  ;;  %v85_v24 = vsub.f32 %v82_v16, %v52_v15  ;;  %v1952_v25 = vsub.f32 %v62_v18, %v50_v17  ;;  %v2003_v26 = vadd.f32 %v62_v18, %v50_v17 }
  0x23   :  { %119 = vrot.lane.b32.xlu1 %v1938_v19, %s1857_s3  ;;  %115 = vrot.lane.b32.xlu0 %v1942_v21, %s1857_s3  ;;  %vm806_vm12 = vcmask 154624   ;;  %vm726_vm13 = vcmask 146432   ;;  %vm646_vm14 = vcmask 15360   ;;  %vm566_vm15 = vcmask 7168  }
  0x27   :  { %121 = vrot.lane.b32.xlu1 %v85_v24, %s1857_s3  ;;  %117 = vrot.lane.b32.xlu0 %v1952_v25, %s1857_s3 }
  0x2b   :  { %155 = vrot.lane.b32.xlu1 %v1952_v25, %s1858_s4  ;;  %153 = vrot.lane.b32.xlu0 %v1942_v21, %s1858_s4 }
  0x2f   :  { %159 = vrot.lane.b32.xlu1 %v85_v24, %s1858_s4  ;;  %157 = vrot.lane.b32.xlu0 %v1938_v19, %s1858_s4 }
  0x33   :  { %193 = vrot.lane.b32.xlu1 %v1952_v25, %s1859_s29  ;;  %191 = vrot.lane.b32.xlu0 %v1942_v21, %s1859_s29 }
  0x37   :  { %197 = vrot.lane.b32.xlu1 %v85_v24, %s1859_s29  ;;  %195 = vrot.lane.b32.xlu0 %v1938_v19, %s1859_s29 }
  0x3b   :  { %231 = vrot.lane.b32.xlu1 %v1952_v25, %s1860_s30  ;;  %229 = vrot.lane.b32.xlu0 %v1942_v21, %s1860_s30 }
  0x3f   :  { %235 = vrot.lane.b32.xlu1 %v85_v24, %s1860_s30  ;;  %233 = vrot.lane.b32.xlu0 %v1938_v19, %s1860_s30 }
  0x43   :  { %269 = vrot.lane.b32.xlu1 %v1952_v25, %s1861_s6  ;;  %267 = vrot.lane.b32.xlu0 %v1942_v21, %s1861_s6 }
  0x47   :  { %273 = vrot.lane.b32.xlu1 %v85_v24, %s1861_s6  ;;  %271 = vrot.lane.b32.xlu0 %v1938_v19, %s1861_s6 }
  0x4b   :  { %307 = vrot.lane.b32.xlu1 %v1952_v25, %s1862_s7  ;;  %305 = vrot.lane.b32.xlu0 %v1942_v21, %s1862_s7 }
  0x4f   :  { %311 = vrot.lane.b32.xlu1 %v85_v24, %s1862_s7  ;;  %309 = vrot.lane.b32.xlu0 %v1938_v19, %s1862_s7 }
  0x53   :  { %345 = vrot.lane.b32.xlu1 %v1952_v25, %s1863_s8  ;;  %343 = vrot.lane.b32.xlu0 %v1942_v21, %s1863_s8 }
  0x57   :  { %349 = vrot.lane.b32.xlu1 %v85_v24, %s1863_s8  ;;  %347 = vrot.lane.b32.xlu0 %v1938_v19, %s1863_s8 }
  0x5b   :  { %383 = vrot.lane.b32.xlu1 %v1952_v25, %s1864_s9  ;;  %381 = vrot.lane.b32.xlu0 %v1942_v21, %s1864_s9 }
  0x5f   :  { %387 = vrot.lane.b32.xlu1 %v85_v24, %s1864_s9  ;;  %385 = vrot.lane.b32.xlu0 %v1938_v19, %s1864_s9 }
  0x63   :  { %286 = vrot.lane.b32.xlu1 %v2003_v26, %s1862_s7  ;;  %284 = vrot.lane.b32.xlu0 %v1944_v22, %s1862_s7 }
  0x67   :  { %290 = vrot.lane.b32.xlu1 %v1946_v23, %s1862_s7  ;;  %288 = vrot.lane.b32.xlu0 %v1940_v20, %s1862_s7 }
  0x6b   :  { %248 = vrot.lane.b32.xlu1 %v2003_v26, %s1861_s6  ;;  %246 = vrot.lane.b32.xlu0 %v1944_v22, %s1861_s6 }
  0x6f   :  { %252 = vrot.lane.b32.xlu1 %v1946_v23, %s1861_s6  ;;  %250 = vrot.lane.b32.xlu0 %v1940_v20, %s1861_s6 }
  0x73   :  { %210 = vrot.lane.b32.xlu1 %v2003_v26, %s1860_s30  ;;  %208 = vrot.lane.b32.xlu0 %v1944_v22, %s1860_s30 }
  0x77   :  { %214 = vrot.lane.b32.xlu1 %v1946_v23, %s1860_s30  ;;  %212 = vrot.lane.b32.xlu0 %v1940_v20, %s1860_s30 }
  0x7b   :  { %172 = vrot.lane.b32.xlu1 %v2003_v26, %s1859_s29  ;;  %170 = vrot.lane.b32.xlu0 %v1944_v22, %s1859_s29 }
  0x7f   :  { %176 = vrot.lane.b32.xlu1 %v1946_v23, %s1859_s29  ;;  %174 = vrot.lane.b32.xlu0 %v1940_v20, %s1859_s29 }
  0x83   :  { %134 = vrot.lane.b32.xlu1 %v2003_v26, %s1858_s4  ;;  %132 = vrot.lane.b32.xlu0 %v1944_v22, %s1858_s4 }
  0x87   :  { %138 = vrot.lane.b32.xlu1 %v1946_v23, %s1858_s4  ;;  %136 = vrot.lane.b32.xlu0 %v1940_v20, %s1858_s4 }
  0x8b   :  { %92 = vrot.lane.b32.xlu1 %v2003_v26, %s1857_s3  ;;  %90 = vrot.lane.b32.xlu0 %v1944_v22, %s1857_s3 }
  0x8f   :  { %96 = vrot.lane.b32.xlu1 %v1946_v23, %s1857_s3  ;;  %94 = vrot.lane.b32.xlu0 %v1940_v20, %s1857_s3 }
  0x93   :  { %362 = vrot.lane.b32.xlu1 %v2003_v26, %s1864_s9  ;;  %360 = vrot.lane.b32.xlu0 %v1944_v22, %s1864_s9 }
  0x95   :  { %v120_v27 = vpop.permute.xlu1 %119  ;;  %v116_v28 = vpop.permute.xlu0 %115 }
  0x97   :  { %366 = vrot.lane.b32.xlu1 %v1946_v23, %s1864_s9  ;;  %364 = vrot.lane.b32.xlu0 %v1940_v20, %s1864_s9 }
  0x99   :  { %v122_v29 = vpop.permute.xlu1 %121  ;;  %v118_v30 = vpop.permute.xlu0 %117 }
  0x9a   :  { %v123_v49 = vsel %vm98_vm0, %v116_v28, %v118_v30  ;;  %v125_v54 = vsel %vm98_vm0, %v120_v27, %v122_v29  ;;  %v124_v55 = vsel %vm98_vm0, %v118_v30, %v120_v27 }
  0x9b   :  { %324 = vrot.lane.b32.xlu1 %v2003_v26, %s1863_s8  ;;  %322 = vrot.lane.b32.xlu0 %v1944_v22, %s1863_s8  ;;  %v129_v51 = vmax.f32 %v1942_v21, %v123_v49  ;;  %v131_v61 = vmax.f32 %v1938_v19, %v125_v54  ;;  %v130_v62 = vmax.f32 %v1952_v25, %v124_v55 }
  0x9d   :  { %v156_v31 = vpop.permute.xlu1 %155  ;;  %v154_v32 = vpop.permute.xlu0 %153 }
  0x9e   :  { %v161_v50 = vsel %vm140_vm1, %v154_v32, %v156_v31 }
  0x9f   :  { %328 = vrot.lane.b32.xlu1 %v1946_v23, %s1863_s8  ;;  %326 = vrot.lane.b32.xlu0 %v1940_v20, %s1863_s8  ;;  %v167_v57 = vmax.f32 %v129_v51, %v161_v50 }
  0xa1   :  { %v160_v33 = vpop.permute.xlu1 %159  ;;  %v158_v34 = vpop.permute.xlu0 %157 }
  0xa2   :  { %v162_v58 = vsel %vm140_vm1, %v156_v31, %v158_v34  ;;  %v163_v59 = vsel %vm140_vm1, %v158_v34, %v160_v33 }
  0xa3   :  { %v168_v10 = vmax.f32 %v130_v62, %v162_v58  ;;  %v169_v11 = vmax.f32 %v131_v61, %v163_v59 }
  0xa5   :  { %v194_v35 = vpop.permute.xlu1 %193  ;;  %v192_v36 = vpop.permute.xlu0 %191 }
  0xa6   :  { %v199_v56 = vsel %vm178_vm2, %v192_v36, %v194_v35 }
  0xa7   :  { %v205_v63 = vmax.f32 %v167_v57, %v199_v56 }
  0xa9   :  { %v198_v37 = vpop.permute.xlu1 %197  ;;  %v196_v38 = vpop.permute.xlu0 %195 }
  0xaa   :  { %v200_v6 = vsel %vm178_vm2, %v194_v35, %v196_v38  ;;  %v201_v8 = vsel %vm178_vm2, %v196_v38, %v198_v37 }
  0xab   :  { %v206_v16 = vmax.f32 %v168_v10, %v200_v6  ;;  %v207_v17 = vmax.f32 %v169_v11, %v201_v8 }
  0xad   :  { %v232_v39 = vpop.permute.xlu1 %231  ;;  %v230_v40 = vpop.permute.xlu0 %229 }
  0xae   :  { %v237_v60 = vsel %vm216_vm3, %v230_v40, %v232_v39 }
  0xaf   :  { %v243_v12 = vmax.f32 %v205_v63, %v237_v60 }
  0xb1   :  { %v236_v41 = vpop.permute.xlu1 %235  ;;  %v234_v42 = vpop.permute.xlu0 %233 }
  0xb2   :  { %v238_v13 = vsel %vm216_vm3, %v232_v39, %v234_v42  ;;  %v239_v14 = vsel %vm216_vm3, %v234_v42, %v236_v41 }
  0xb3   :  { %v244_v27 = vmax.f32 %v206_v16, %v238_v13  ;;  %v245_v28 = vmax.f32 %v207_v17, %v239_v14 }
  0xb5   :  { %v270_v43 = vpop.permute.xlu1 %269  ;;  %v268_v44 = vpop.permute.xlu0 %267 }
  0xb6   :  { %v275_v9 = vsel %vm254_vm4, %v268_v44, %v270_v43 }
  0xb7   :  { %v281_v18 = vmax.f32 %v243_v12, %v275_v9 }
  0xb9   :  { %v274_v45 = vpop.permute.xlu1 %273  ;;  %v272_v46 = vpop.permute.xlu0 %271 }
  0xba   :  { %v276_v23 = vsel %vm254_vm4, %v270_v43, %v272_v46  ;;  %v277_v24 = vsel %vm254_vm4, %v272_v46, %v274_v45 }
  0xbb   :  { %v282_v32 = vmax.f32 %v244_v27, %v276_v23  ;;  %v283_v33 = vmax.f32 %v245_v28, %v277_v24 }
  0xbd   :  { %v308_v47 = vpop.permute.xlu1 %307  ;;  %v306_v48 = vpop.permute.xlu0 %305 }
  0xbe   :  { %v313_v15 = vsel %vm292_vm5, %v306_v48, %v308_v47 }
  0xbf   :  { %v319_v29 = vmax.f32 %v281_v18, %v313_v15 }
  0xc1   :  { %v312_v52 = vpop.permute.xlu1 %311  ;;  %v310_v53 = vpop.permute.xlu0 %309 }
  0xc2   :  { %v314_v30 = vsel %vm292_vm5, %v308_v47, %v310_v53  ;;  %v315_v31 = vsel %vm292_vm5, %v310_v53, %v312_v52 }
  0xc3   :  { %v320_v40 = vmax.f32 %v282_v32, %v314_v30  ;;  %v321_v41 = vmax.f32 %v283_v33, %v315_v31 }
  0xc5   :  { %v346_v0 = vpop.permute.xlu1 %345  ;;  %v344_v1 = vpop.permute.xlu0 %343 }
  0xc6   :  { %v351_v25 = vsel %vm330_vm6, %v344_v1, %v346_v0 }
  0xc7   :  { %v357_v34 = vmax.f32 %v319_v29, %v351_v25 }
  0xc9   :  { %v350_v19 = vpop.permute.xlu1 %349  ;;  %v348_v21 = vpop.permute.xlu0 %347 }
  0xca   :  { %v352_v37 = vsel %vm330_vm6, %v346_v0, %v348_v21  ;;  %v353_v38 = vsel %vm330_vm6, %v348_v21, %v350_v19 }
  0xcb   :  { %v358_v43 = vmax.f32 %v320_v40, %v352_v37  ;;  %v359_v44 = vmax.f32 %v321_v41, %v353_v38 }
  0xcd   :  { %v384_v35 = vpop.permute.xlu1 %383  ;;  %v382_v36 = vpop.permute.xlu0 %381 }
  0xce   :  { %v389_v39 = vsel %vm368_vm7, %v382_v36, %v384_v35 }
  0xcf   :  { %v395_v42 = vmax.f32 %v357_v34, %v389_v39 }
  0xd1   :  { %v442_v45 = vsel %vm398_vm8, %v395_v42, -inf  ;;  %v463_v46 = vsel %vm420_vm9, %v395_v42, -inf  ;;  %v388_v47 = vpop.permute.xlu1 %387  ;;  %v386_v48 = vpop.permute.xlu0 %385 }
  0xd2   :  { %v443_v49 = vrot.slane %v442_v45, 4  ;;  %v464_v50 = vrot.slane %v463_v46, 4  ;;  %v390_v51 = vsel %vm368_vm7, %v384_v35, %v386_v48  ;;  %v391_v52 = vsel %vm368_vm7, %v386_v48, %v388_v47 }
  0xd3   :  { %v396_v53 = vmax.f32 %v358_v43, %v390_v51  ;;  %v397_v54 = vmax.f32 %v359_v44, %v391_v52 }
  0xd4   :  { %v444_v55 = vmax.f32 %v442_v45, %v443_v49  ;;  %v465_v56 = vmax.f32 %v463_v46, %v464_v50 }
  0xd5   :  { %v449_v57 = vsel %vm398_vm8, %v396_v53, -inf  ;;  %v456_v58 = vsel %vm398_vm8, %v397_v54, -inf  ;;  %v470_v59 = vsel %vm420_vm9, %v396_v53, -inf  ;;  %v477_v60 = vsel %vm420_vm9, %v397_v54, -inf  ;;  %v287_v61 = vpop.permute.xlu1 %286  ;;  %v285_v62 = vpop.permute.xlu0 %284 }
  0xd6   :  { %v445_v63 = vrot.slane %v444_v55, 2  ;;  %v466_v0 = vrot.slane %v465_v56, 2  ;;  %v450_v1 = vrot.slane %v449_v57, 4  ;;  %v457_v6 = vrot.slane %v456_v58, 4 }
  0xd7   :  { %v471_v8 = vrot.slane %v470_v59, 4  ;;  %v478_v9 = vrot.slane %v477_v60, 4  ;;  %v2106_v10 = vsel %vm292_vm5, %v285_v62, %v287_v61 }
  0xd8   :  { %v451_v11 = vmax.f32 %v449_v57, %v450_v1  ;;  %v458_v12 = vmax.f32 %v456_v58, %v457_v6  ;;  %980 = vrot.lane.b32.xlu0 %v2106_v10, %s1865_s10  ;;  %v446_v17 = vmax.f32 %v444_v55, %v445_v63  ;;  %v467_v18 = vmax.f32 %v465_v56, %v466_v0 }
  0xd9   :  { %v472_v13 = vmax.f32 %v470_v59, %v471_v8  ;;  %v479_v14 = vmax.f32 %v477_v60, %v478_v9  ;;  %v291_v15 = vpop.permute.xlu1 %290  ;;  %v289_v16 = vpop.permute.xlu0 %288 }
  0xda   :  { %v452_v19 = vrot.slane %v451_v11, 2  ;;  %v459_v21 = vrot.slane %v458_v12, 2  ;;  %v2111_v25 = vsel %vm292_vm5, %v289_v16, %v291_v15  ;;  %v2114_v27 = vsel %vm292_vm5, %v287_v61, %v289_v16 }
  0xdb   :  { %v473_v23 = vrot.slane %v472_v13, 2  ;;  %v480_v24 = vrot.slane %v479_v14, 2  ;;  %2839 = vst [vmem:[#allocation16_spill] sm:$0xff] %v2111_v25  ;;  %982 = vrot.lane.b32.xlu1 %v2114_v27, %s1865_s10  ;;  %v447_v32 = vrot.slane %v446_v17, 1  ;;  %v468_v35 = vrot.slane %v467_v18, 1 }
  0xdc   :  { %v453_v28 = vmax.f32 %v451_v11, %v452_v19  ;;  %984 = vrot.lane.b32.xlu0 %v2111_v25, %s1865_s10  ;;  %v460_v36 = vmax.f32 %v458_v12, %v459_v21 }
  0xdd   :  { %v474_v29 = vmax.f32 %v472_v13, %v473_v23  ;;  %v249_v30 = vpop.permute.xlu1 %248  ;;  %v247_v31 = vpop.permute.xlu0 %246  ;;  %v481_v38 = vmax.f32 %v479_v14, %v480_v24  ;;  %v2134_v45 = vmax.f32 %v446_v17, %v447_v32  ;;  %v2136_v46 = vmax.f32 %v467_v18, %v468_v35 }
  0xde   :  { %v454_v33 = vrot.slane %v453_v28, 1  ;;  %v2121_v34 = vsel %vm254_vm4, %v247_v31, %v249_v30  ;;  %v461_v47 = vrot.slane %v460_v36, 1 }
  0xdf   :  { %v475_v37 = vrot.slane %v474_v29, 1  ;;  %2843 = vst [vmem:[#allocation20_spill] sm:$0xff] %v2134_v45  ;;  %2844 = vst [vmem:[#allocation21_spill] sm:$0xff] %v2136_v46  ;;  %v482_v48 = vrot.slane %v481_v38, 1  ;;  %v2148_v52 = vsel %vm398_vm8, %v2134_v45, %v2136_v46 }
  0xe0   :  { %900 = vrot.lane.b32.xlu0 %v2121_v34, %s1866_s11  ;;  %v2124_v41 = vmax.f32 %v453_v28, %v454_v33  ;;  %v2150_v53 = vmax.f32 %v460_v36, %v461_v47 }
  0xe1   :  { %v253_v39 = vpop.permute.xlu1 %252  ;;  %v251_v40 = vpop.permute.xlu0 %250  ;;  %v2126_v42 = vmax.f32 %v474_v29, %v475_v37  ;;  %v2152_v54 = vmax.f32 %v481_v38, %v482_v48 }
  0xe2   :  { %2840 = vst [vmem:[#allocation17_spill] sm:$0xff] %v2124_v41  ;;  %v2129_v43 = vsel %vm254_vm4, %v251_v40, %v253_v39  ;;  %v2132_v44 = vsel %vm254_vm4, %v249_v30, %v251_v40  ;;  %2845 = vst [vmem:[#allocation22_spill] sm:$0xff] %v2150_v53 }
  0xe3   :  { %2841 = vst [vmem:[#allocation18_spill] sm:$0xff] %v2126_v42  ;;  %2842 = vst [vmem:[#allocation19_spill] sm:$0xff] %v2129_v43  ;;  %902 = vrot.lane.b32.xlu1 %v2132_v44, %s1866_s11  ;;  %v2143_v51 = vsel %vm398_vm8, %v2124_v41, %v2126_v42  ;;  %v2161_v57 = vsel %vm398_vm8, %v2150_v53, %v2152_v54 }
  0xe4   :  { %904 = vrot.lane.b32.xlu0 %v2129_v43, %s1866_s11  ;;  %2846 = vst [vmem:[#allocation23_spill] sm:$0xff] %v2152_v54 }
  0xe5   :  { %v211_v49 = vpop.permute.xlu1 %210  ;;  %v209_v50 = vpop.permute.xlu0 %208 }
  0xe6   :  { %v2177_v6 = vsel %vm216_vm3, %v209_v50, %v211_v49 }
  0xe7   :  { %962 = vrot.lane.b32.xlu1 %v2143_v51, %s1865_s10  ;;  %2847 = vst [vmem:[#allocation24_spill] sm:$0xff] %v2177_v6 }
  0xe8   :  { %960 = vrot.lane.b32.xlu0 %v2148_v52, %s1865_s10 }
  0xe9   :  { %v215_v55 = vpop.permute.xlu1 %214  ;;  %v213_v56 = vpop.permute.xlu0 %212 }
  0xea   :  { %v2184_v11 = vsel %vm216_vm3, %v213_v56, %v215_v55  ;;  %v2199_v15 = vsel %vm216_vm3, %v211_v49, %v213_v56 }
  0xeb   :  { %880 = vrot.lane.b32.xlu1 %v2148_v52, %s1866_s11  ;;  %2848 = vst [vmem:[#allocation25_spill] sm:$0xff] %v2184_v11 }
  0xec   :  { %964 = vrot.lane.b32.xlu0 %v2161_v57, %s1865_s10 }
  0xed   :  { %v173_v58 = vpop.permute.xlu1 %172  ;;  %v171_v59 = vpop.permute.xlu0 %170 }
  0xee   :  { %v2202_v16 = vsel %vm178_vm2, %v171_v59, %v173_v58 }
  0xef   :  { %884 = vrot.lane.b32.xlu1 %v2161_v57, %s1866_s11  ;;  %2850 = vst [vmem:[#allocation27_spill] sm:$0xff] %v2202_v16 }
  0xf0   :  { %882 = vrot.lane.b32.xlu0 %v2143_v51, %s1866_s11 }
  0xf1   :  { %v177_v60 = vpop.permute.xlu1 %176  ;;  %v175_v61 = vpop.permute.xlu0 %174 }
  0xf2   :  { %v2227_v32 = vsel %vm178_vm2, %v175_v61, %v177_v60  ;;  %v2230_v33 = vsel %vm178_vm2, %v173_v58, %v175_v61 }
  0xf3   :  { %800 = vrot.lane.b32.xlu1 %v2148_v52, %s1867_s12  ;;  %2854 = vst [vmem:[#allocation31_spill] sm:$0xff] %v2227_v32  ;;  %2855 = vst [vmem:[#allocation32_spill] sm:$0xff] %v2230_v33 }
  0xf4   :  { %802 = vrot.lane.b32.xlu0 %v2143_v51, %s1867_s12 }
  0xf5   :  { %v135_v62 = vpop.permute.xlu1 %134  ;;  %v133_v63 = vpop.permute.xlu0 %132 }
  0xf6   :  { %v2187_v12 = vsel %vm140_vm1, %v133_v63, %v135_v62 }
  0xf7   :  { %804 = vrot.lane.b32.xlu1 %v2161_v57, %s1867_s12  ;;  %2849 = vst [vmem:[#allocation26_spill] sm:$0xff] %v2187_v12 }
  0xf8   :  { %722 = vrot.lane.b32.xlu0 %v2143_v51, %s1868_s13 }
  0xf9   :  { %v139_v0 = vpop.permute.xlu1 %138  ;;  %v137_v1 = vpop.permute.xlu0 %136 }
  0xfa   :  { %v2212_v24 = vsel %vm140_vm1, %v137_v1, %v139_v0  ;;  %v2215_v28 = vsel %vm140_vm1, %v135_v62, %v137_v1 }
  0xfb   :  { %720 = vrot.lane.b32.xlu1 %v2148_v52, %s1868_s13  ;;  %2853 = vst [vmem:[#allocation30_spill] sm:$0xff] %v2212_v24 }
  0xfc   :  { %820 = vrot.lane.b32.xlu0 %v2177_v6, %s1867_s12 }
  0xfd   :  { %v93_v8 = vpop.permute.xlu1 %92  ;;  %v91_v9 = vpop.permute.xlu0 %90 }
  0xfe   :  { %v2190_v13 = vsel %vm98_vm0, %v91_v9, %v93_v8 }
  0xff   :  { %724 = vrot.lane.b32.xlu1 %v2161_v57, %s1868_s13  ;;  %v108_v14 = vmax.f32 %v1944_v22, %v2190_v13 }
 0x100   :  { %824 = vrot.lane.b32.xlu0 %v2184_v11, %s1867_s12 }
 0x101   :  { %v97_v17 = vpop.permute.xlu1 %96  ;;  %v95_v18 = vpop.permute.xlu0 %94  ;;  %v150_v19 = vmax.f32 %v108_v14, %v2187_v12 }
 0x102   :  { %v2206_v21 = vsel %vm98_vm0, %v93_v8, %v95_v18  ;;  %v2209_v23 = vsel %vm98_vm0, %v95_v18, %v97_v17 }
 0x103   :  { %2851 = vst [vmem:[#allocation28_spill] sm:$0xff] %v2206_v21  ;;  %2852 = vst [vmem:[#allocation29_spill] sm:$0xff] %v2209_v23  ;;  %v109_v29 = vmax.f32 %v2003_v26, %v2206_v21  ;;  %v110_v30 = vmax.f32 %v1940_v20, %v2209_v23  ;;  %822 = vrot.lane.b32.xlu1 %v2199_v15, %s1867_s12  ;;  %v188_v31 = vmax.f32 %v150_v19, %v2202_v16 }
 0x104   :  { %642 = vrot.lane.b32.xlu0 %v2143_v51, %s1869_s14 }
 0x105   :  { %v363_v35 = vpop.permute.xlu1 %362  ;;  %v361_v36 = vpop.permute.xlu0 %360  ;;  %v152_v37 = vmax.f32 %v110_v30, %v2212_v24  ;;  %v151_v38 = vmax.f32 %v109_v29, %v2215_v28  ;;  %v226_v39 = vmax.f32 %v188_v31, %v2177_v6 }
 0x106   :  { %v2252_v63 = vsel %vm368_vm7, %v361_v36, %v363_v35 }
 0x107   :  { %640 = vrot.lane.b32.xlu1 %v2148_v52, %s1869_s14  ;;  %v190_v40 = vmax.f32 %v152_v37, %v2227_v32  ;;  %v189_v47 = vmax.f32 %v151_v38, %v2230_v33  ;;  %v264_v56 = vmax.f32 %v226_v39, %v2121_v34 }
 0x108   :  { %740 = vrot.lane.b32.xlu0 %v2202_v16, %s1868_s13 }
 0x109   :  { %v367_v48 = vpop.permute.xlu1 %366  ;;  %v365_v49 = vpop.permute.xlu0 %364  ;;  %v228_v50 = vmax.f32 %v190_v40, %v2184_v11  ;;  %v227_v55 = vmax.f32 %v189_v47, %v2199_v15  ;;  %v302_v62 = vmax.f32 %v264_v56, %v2106_v10 }
 0x10a   :  { %v2267_v19 = vsel %vm368_vm7, %v363_v35, %v365_v49  ;;  %v2270_v29 = vsel %vm368_vm7, %v365_v49, %v367_v48 }
 0x10b   :  { %644 = vrot.lane.b32.xlu1 %v2161_v57, %s1869_s14  ;;  %v266_v60 = vmax.f32 %v228_v50, %v2129_v43  ;;  %v265_v61 = vmax.f32 %v227_v55, %v2132_v44  ;;  %v490_v55 = vmul.f32 2.0, %v1928_v7 }
 0x10c   :  { %744 = vrot.lane.b32.xlu0 %v2227_v32, %s1868_s13 }
 0x10d   :  { %v325_v58 = vpop.permute.xlu1 %324  ;;  %v323_v59 = vpop.permute.xlu0 %322  ;;  %v304_v14 = vmax.f32 %v266_v60, %v2111_v25  ;;  %v303_v17 = vmax.f32 %v265_v61, %v2114_v27  ;;  %v2319_v60 = vrot.slane %v490_v55, %v1919_v3 }
 0x10e   :  { %v2255_v0 = vsel %vm330_vm6, %v323_v59, %v325_v58 }
 0x10f   :  { %742 = vrot.lane.b32.xlu1 %v2230_v33, %s1868_s13  ;;  %v340_v1 = vmax.f32 %v302_v62, %v2255_v0 }
 0x110   :  { %562 = vrot.lane.b32.xlu0 %v2143_v51, %s1870_s15 }
 0x111   :  { %v329_v8 = vpop.permute.xlu1 %328  ;;  %v327_v9 = vpop.permute.xlu0 %326  ;;  %v2264_v18 = vmax.f32 %v340_v1, %v2252_v63  ;;  %v2326_v1 = vrot.slane %v490_v55, %v1921_v4 }
 0x112   :  { %v2273_v30 = vsel %vm330_vm6, %v325_v58, %v327_v9  ;;  %v2276_v31 = vsel %vm330_vm6, %v327_v9, %v329_v8 }
 0x113   :  { %560 = vrot.lane.b32.xlu1 %v2148_v52, %s1870_s15  ;;  %v342_v36 = vmax.f32 %v304_v14, %v2276_v31  ;;  %v341_v37 = vmax.f32 %v303_v17, %v2273_v30 }
 0x114   :  { %660 = vrot.lane.b32.xlu0 %v2187_v12, %s1869_s14 }
 0x115   :  { %v2284_v35 = vmax.f32 %v342_v36, %v2270_v29  ;;  %v2287_v38 = vmax.f32 %v341_v37, %v2267_v19 }
 0x117   :  { %564 = vrot.lane.b32.xlu1 %v2161_v57, %s1870_s15 }
 0x118   :  { %664 = vrot.lane.b32.xlu0 %v2212_v24, %s1869_s14 }
 0x11b   :  { %662 = vrot.lane.b32.xlu1 %v2215_v28, %s1869_s14 }
 0x11c   :  { %582 = vrot.lane.b32.xlu0 %v2206_v21, %s1870_s15 }
 0x11f   :  { %580 = vrot.lane.b32.xlu1 %v2190_v13, %s1870_s15 }
 0x120   :  { %1120 = vrot.lane.b32.xlu0 %v2148_v52, %s1871_s16 }
 0x123   :  { %584 = vrot.lane.b32.xlu1 %v2209_v23, %s1870_s15 }
 0x124   :  { %1124 = vrot.lane.b32.xlu0 %v2161_v57, %s1871_s16 }
 0x127   :  { %1122 = vrot.lane.b32.xlu1 %v2143_v51, %s1871_s16 }
 0x128   :  { %1042 = vrot.lane.b32.xlu0 %v2143_v51, %s1872_s17 }
 0x12b   :  { %1040 = vrot.lane.b32.xlu1 %v2148_v52, %s1872_s17 }
 0x12c   :  { %1140 = vrot.lane.b32.xlu0 %v2252_v63, %s1871_s16 }
 0x12f   :  { %1044 = vrot.lane.b32.xlu1 %v2161_v57, %s1872_s17 }
 0x130   :  { %1144 = vrot.lane.b32.xlu0 %v2270_v29, %s1871_s16 }
 0x133   :  { %1142 = vrot.lane.b32.xlu1 %v2267_v19, %s1871_s16 }
 0x134   :  { %1062 = vrot.lane.b32.xlu0 %v2273_v30, %s1872_s17 }
 0x137   :  { %1060 = vrot.lane.b32.xlu1 %v2255_v0, %s1872_s17 }
 0x13b   :  { %1064 = vrot.lane.b32.xlu1 %v2276_v31, %s1872_s17 }
 0x14a   :  { %v981_v39 = vpop.permute.xlu0 %980 }
 0x14d   :  { %v983_v47 = vpop.permute.xlu1 %982 }
 0x14e   :  { %v985_v40 = vpop.permute.xlu0 %984  ;;  %v2310_v48 = vsel %vm966_vm10, %v981_v39, %v983_v47 }
 0x14f   :  { %v987_v32 = vsel %vm966_vm10, %v983_v47, %v985_v40 }
 0x152   :  { %v901_v49 = vpop.permute.xlu0 %900 }
 0x155   :  { %v903_v50 = vpop.permute.xlu1 %902 }
 0x156   :  { %v905_v56 = vpop.permute.xlu0 %904 }
 0x157   :  { %v2314_v58 = vsel %vm886_vm11, %v903_v50, %v905_v56 }
 0x159   :  { %v2316_v59 = vpop.permute.xlu1 %962 }
 0x15a   :  { %v2321_v61 = vpop.permute.xlu0 %960 }
 0x15b   :  { %v973_v62 = vsub.f32 %v2319_v60, %v2321_v61 }
 0x15d   :  { %v992_v8 = vsub.f32 %v973_v62, %v981_v39  ;;  %v881_v9 = vpop.permute.xlu1 %880 }
 0x15e   :  { %v893_v7 = vsub.f32 %v2319_v60, %v881_v9  ;;  %v965_v14 = vpop.permute.xlu0 %964 }
 0x15f   :  { %v996_v17 = vmul.f32 1.442695, %v992_v8  ;;  %v976_v36 = vsub.f32 %v2326_v1, %v965_v14 }
 0x160   :  { %v912_v37 = vsub.f32 %v893_v7, %v901_v49 }
 0x161   :  { %1659 = vpow2.f32 %v996_v17  ;;  %v995_v3 = vsub.f32 %v976_v36, %v985_v40  ;;  %v2330_v54 = vpop.permute.xlu1 %884  ;;  %v968_v36 = vsel %vm966_vm10, %v2316_v59, %v965_v14  ;;  %v2359_v14 = vrot.slane %v490_v55, %v1923_v5 }
 0x162   :  { %v916_v53 = vmul.f32 1.442695, %v912_v37  ;;  %v896_v42 = vsub.f32 %v2326_v1, %v2330_v54  ;;  %v2334_v41 = vpop.permute.xlu0 %882  ;;  %v2345_v37 = vrot.slane %v490_v55, %v1917_v2  ;;  %v906_v55 = vsel %vm886_vm11, %v901_v49, %v903_v50 }
 0x163   :  { %v1002_v39 = vmul.f32 1.442695, %v995_v3 }
 0x164   :  { %1661 = vpow2.f32 %v916_v53  ;;  %v915_v62 = vsub.f32 %v896_v42, %v905_v56 }
 0x165   :  { %v2336_v4 = vpop.permute.xlu1 %800  ;;  %1663 = vpow2.f32 %v1002_v39  ;;  %v975_v39 = vsub.f32 %v2345_v37, %v968_v36 }
 0x166   :  { %v2338_v46 = vpop.permute.xlu0 %802  ;;  %v922_v8 = vmul.f32 1.442695, %v915_v62  ;;  %v813_v3 = vsub.f32 %v2319_v60, %v2336_v4  ;;  %v887_v62 = vsel %vm886_vm11, %v881_v9, %v2334_v41 }
 0x167   :  { %v894_v36 = vsub.f32 %v2359_v14, %v887_v62  ;;  %v994_v9 = vsub.f32 %v975_v39, %v987_v32 }
 0x168   :  { %1665 = vpow2.f32 %v922_v8 }
 0x169   :  { %v805_v7 = vpop.permute.xlu1 %804  ;;  %v1000_v47 = vmul.f32 1.442695, %v994_v9 }
 0x16a   :  { %v2340_v17 = vpop.permute.xlu0 %722  ;;  %v816_v2 = vsub.f32 %v2326_v1, %v805_v7  ;;  %v808_v12 = vsel %vm806_vm12, %v2338_v46, %v805_v7 }
 0x16b   :  { %v815_v32 = vsub.f32 %v2345_v37, %v808_v12 }
 0x16d   :  { %v2349_v42 = vpop.permute.xlu1 %720 }
 0x16e   :  { %v1660_v53 = vpop.eup %1659  ;;  %v2351_v56 = vpop.permute.xlu0 %820  ;;  %v733_v49 = vsub.f32 %v2319_v60, %v2349_v42 }
 0x16f   :  { %v832_v45 = vsub.f32 %v813_v3, %v2351_v56  ;;  %1008 = vrot.lane.b32.xlu0 %v1660_v53, %s1862_s7 }
 0x171   :  { %v1662_v8 = vpop.eup %1661  ;;  %v836_v23 = vmul.f32 1.442695, %v832_v45  ;;  %v2362_v24 = vpop.permute.xlu1 %724  ;;  %v913_v45 = vsub.f32 %v894_v36, %v906_v55 }
 0x172   :  { %v825_v21 = vpop.permute.xlu0 %824  ;;  %928 = vrot.lane.b32.xlu1 %v1662_v8, %s1861_s6  ;;  %v1664_v53 = vpop.eup %1663  ;;  %v2828_v8 = vmov 0.0   ;;  %v728_v36 = vsel %vm726_vm13, %v2340_v17, %v2362_v24 }
 0x173   :  { %1667 = vpow2.f32 %v836_v23  ;;  %v835_v3 = vsub.f32 %v816_v2, %v825_v21  ;;  %v918_v39 = vmul.f32 1.442695, %v913_v45  ;;  %1316 = vmatprep.subr.mxu1 %v2828_v8  ;;  %v735_v55 = vsub.f32 %v2345_v37, %v728_v36 }
 0x175   :  { %v842_v5 = vmul.f32 1.442695, %v835_v3  ;;  %v2368_v11 = vpop.permute.xlu1 %822  ;;  %v1666_v23 = vpop.eup %1665 }
 0x176   :  { %v2372_v40 = vpop.permute.xlu0 %642  ;;  %1014 = vrot.lane.b32.xlu1 %v1664_v53, %s1862_s7  ;;  %v827_v2 = vsel %vm806_vm12, %v2368_v11, %v825_v21 }
 0x177   :  { %1669 = vpow2.f32 %v842_v5  ;;  %v834_v7 = vsub.f32 %v815_v32, %v827_v2 }
 0x178   :  { %1671 = vpow2.f32 %v1000_v47 }
 0x179   :  { %v2380_v50 = vpop.permute.xlu1 %640  ;;  %1673 = vpow2.f32 %v918_v39  ;;  %v840_v3 = vmul.f32 1.442695, %v834_v7 }
 0x17a   :  { %v2382_v62 = vpop.permute.xlu0 %740  ;;  %934 = vrot.lane.b32.xlu1 %v1666_v23, %s1861_s6 }
 0x17b   :  { %v752_v5 = vsub.f32 %v733_v49, %v2382_v62  ;;  %v653_v49 = vsub.f32 %v2319_v60, %v2380_v50 }
 0x17d   :  { %v756_v21 = vmul.f32 1.442695, %v752_v5  ;;  %v2387_v12 = vpop.permute.xlu1 %644 }
 0x17e   :  { %v2392_v9 = vpop.permute.xlu0 %744 }
 0x17f   :  { %1675 = vpow2.f32 %v756_v21 }
 0x180   :  { %v1668_v53 = vpop.eup %1667  ;;  %1677 = vpow2.f32 %v840_v3 }
 0x181   :  { %848 = vrot.lane.b32.xlu0 %v1668_v53, %s1860_s30  ;;  %v2396_v45 = vpop.permute.xlu1 %742 }
 0x182   :  { %v747_v47 = vsel %vm726_vm13, %v2396_v45, %v2392_v9  ;;  %v2401_v2 = vpop.permute.xlu0 %562 }
 0x183   :  { %v754_v23 = vsub.f32 %v735_v55, %v747_v47  ;;  %v648_v55 = vsel %vm646_vm14, %v2372_v40, %v2387_v12 }
 0x184   :  { %v1670_v32 = vpop.eup %1669 }
 0x185   :  { %v760_v39 = vmul.f32 1.442695, %v754_v23  ;;  %854 = vrot.lane.b32.xlu1 %v1670_v32, %s1860_s30  ;;  %v2406_v7 = vpop.permute.xlu1 %560  ;;  %v1672_v36 = vpop.eup %1671  ;;  %v967_v32 = vsel %vm966_vm10, %v2321_v61, %v2316_v59  ;;  %v888_v59 = vsel %vm886_vm11, %v2334_v41, %v2330_v54  ;;  %vm1126_vm10 = vcmask 310272  }
 0x186   :  { %v2408_v5 = vpop.permute.xlu0 %660  ;;  %v1674_v23 = vpop.eup %1673  ;;  %v895_v16 = vsub.f32 %v2345_v37, %v888_v59  ;;  %vm1046_vm11 = vcmask 302080  }
 0x187   :  { %v672_v21 = vsub.f32 %v653_v49, %v2408_v5  ;;  %1679 = vpow2.f32 %v760_v39  ;;  %v655_v39 = vsub.f32 %v2345_v37, %v648_v55  ;;  %v573_v55 = vsub.f32 %v2319_v60, %v2406_v7 }
 0x189   :  { %v676_v53 = vmul.f32 1.442695, %v672_v21  ;;  %1012 = vrot.lane.b32.xlu1 %v1672_v36, %s1862_s7  ;;  %v565_v3 = vpop.permute.xlu1 %564  ;;  %v974_v36 = vsub.f32 %v2359_v14, %v967_v32 }
 0x18a   :  { %v2415_v47 = vpop.permute.xlu0 %664  ;;  %v568_v33 = vsel %vm566_vm15, %v2401_v2, %v565_v3 }
 0x18b   :  { %1681 = vpow2.f32 %v676_v53  ;;  %v993_v32 = vsub.f32 %v974_v36, %v2310_v48  ;;  %v575_v48 = vsub.f32 %v2345_v37, %v568_v33 }
 0x18c   :  { %v1676_v49 = vpop.eup %1675 }
 0x18d   :  { %930 = vrot.lane.b32.xlu1 %v1674_v23, %s1861_s6  ;;  %768 = vrot.lane.b32.xlu0 %v1676_v49, %s1859_s29  ;;  %v663_v21 = vpop.permute.xlu1 %662  ;;  %v1678_v53 = vpop.eup %1677  ;;  %v998_v59 = vmul.f32 1.442695, %v993_v32 }
 0x18e   :  { %v667_v8 = vsel %vm646_vm14, %v663_v21, %v2415_v47  ;;  %v2426_v43 = vpop.permute.xlu0 %582 }
 0x18f   :  { %v674_v61 = vsub.f32 %v655_v39, %v667_v8  ;;  %v807_v8 = vsel %vm806_vm12, %v2336_v4, %v2338_v46  ;;  %v736_v39 = vsub.f32 %v2326_v1, %v2362_v24  ;;  %v826_v4 = vsel %vm806_vm12, %v2351_v56, %v2368_v11 }
 0x190   :  { %v746_v56 = vsel %vm726_vm13, %v2382_v62, %v2396_v45  ;;  %v666_v62 = vsel %vm646_vm14, %v2408_v5, %v663_v21  ;;  %vm1241_vm12 = vcmask 130048  }
 0x191   :  { %v680_v23 = vmul.f32 1.442695, %v674_v61  ;;  %852 = vrot.lane.b32.xlu1 %v1678_v53, %s1860_s30  ;;  %v581_v49 = vpop.permute.xlu1 %580  ;;  %v914_v61 = vsub.f32 %v895_v16, %v2314_v58  ;;  %v755_v46 = vsub.f32 %v736_v39, %v2392_v9  ;;  %v727_v16 = vsel %vm726_vm13, %v2349_v42, %v2340_v17 }
 0x192   :  { %v592_v25 = vsub.f32 %v573_v55, %v581_v49  ;;  %v2438_v6 = vpop.permute.xlu0 %1120  ;;  %v814_v55 = vsub.f32 %v2359_v14, %v807_v8  ;;  %v576_v58 = vsub.f32 %v2326_v1, %v565_v3  ;;  %v647_v42 = vsel %vm646_vm14, %v2380_v50, %v2372_v40 }
 0x193   :  { %1683 = vpow2.f32 %v680_v23  ;;  %v762_v8 = vmul.f32 1.442695, %v755_v46  ;;  %v586_v21 = vsel %vm566_vm15, %v581_v49, %v2426_v43 }
 0x194   :  { %v596_v41 = vmul.f32 1.442695, %v592_v25  ;;  %v1680_v54 = vpop.eup %1679  ;;  %v833_v11 = vsub.f32 %v814_v55, %v826_v4  ;;  %v567_v4 = vsel %vm566_vm15, %v2406_v7, %v2401_v2 }
 0x195   :  { %v585_v36 = vpop.permute.xlu1 %584  ;;  %772 = vrot.lane.b32.xlu1 %v1680_v54, %s1859_s29  ;;  %v734_v54 = vsub.f32 %v2359_v14, %v727_v16 }
 0x196   :  { %1685 = vpow2.f32 %v596_v41  ;;  %v587_v53 = vsel %vm566_vm15, %v2426_v43, %v585_v36  ;;  %v2450_v25 = vpop.permute.xlu0 %1124  ;;  %v920_v41 = vmul.f32 1.442695, %v914_v61  ;;  %v595_v17 = vsub.f32 %v576_v58, %v585_v36 }
 0x197   :  { %v594_v24 = vsub.f32 %v575_v48, %v587_v53  ;;  %1687 = vpow2.f32 %v998_v59  ;;  %v753_v3 = vsub.f32 %v734_v54, %v746_v56  ;;  %v838_v48 = vmul.f32 1.442695, %v833_v11 }
 0x198   :  { %v1682_v33 = vpop.eup %1681  ;;  %v602_v45 = vmul.f32 1.442695, %v595_v17  ;;  %v654_v61 = vsub.f32 %v2359_v14, %v647_v42 }
 0x199   :  { %v600_v23 = vmul.f32 1.442695, %v594_v24  ;;  %688 = vrot.lane.b32.xlu0 %v1682_v33, %s1858_s4  ;;  %v2462_v32 = vpop.permute.xlu1 %1122  ;;  %v758_v36 = vmul.f32 1.442695, %v753_v3  ;;  %v574_v33 = vsub.f32 %v2359_v14, %v567_v4 }
 0x19a   :  { %v2467_v9 = vpop.permute.xlu0 %1042  ;;  %v673_v50 = vsub.f32 %v654_v61, %v666_v62  ;;  %v1128_v46 = vsel %vm1126_vm10, %v2462_v32, %v2450_v25 }
 0x19b   :  { %1689 = vpow2.f32 %v600_v23  ;;  %v1135_v2 = vsub.f32 %v2345_v37, %v1128_v46  ;;  %v593_v16 = vsub.f32 %v574_v33, %v586_v21  ;;  %v656_v23 = vsub.f32 %v2326_v1, %v2387_v12 }
 0x19c   :  { %1691 = vpow2.f32 %v920_v41  ;;  %v678_v55 = vmul.f32 1.442695, %v673_v50 }
 0x19d   :  { %v1041_v39 = vpop.permute.xlu1 %1040  ;;  %1693 = vpow2.f32 %v762_v8  ;;  %v675_v54 = vsub.f32 %v656_v23, %v2415_v47  ;;  %v598_v3 = vmul.f32 1.442695, %v593_v16 }
 0x19e   :  { %v1141_v59 = vpop.permute.xlu0 %1140  ;;  %1695 = vpow2.f32 %v838_v48  ;;  %v1047_v58 = vsel %vm1046_vm11, %v1041_v39, %v2467_v9  ;;  %v1053_v48 = vsub.f32 %v2319_v60, %v1041_v39 }
 0x19f   :  { %1697 = vpow2.f32 %v602_v45  ;;  %v1054_v8 = vsub.f32 %v2359_v14, %v1047_v58  ;;  %v682_v39 = vmul.f32 1.442695, %v675_v54 }
 0x1a0   :  { %v1684_v53 = vpop.eup %1683  ;;  %1699 = vpow2.f32 %v758_v36  ;;  %v1127_v36 = vsel %vm1126_vm10, %v2438_v6, %v2462_v32 }
 0x1a1   :  { %v1045_v40 = vpop.permute.xlu1 %1044  ;;  %692 = vrot.lane.b32.xlu1 %v1684_v53, %s1858_s4  ;;  %1701 = vpow2.f32 %v678_v55  ;;  %v1133_v53 = vsub.f32 %v2319_v60, %v2438_v6  ;;  %v1134_v55 = vsub.f32 %v2359_v14, %v1127_v36  ;;  %v1392_v36 = vld [vmem:[%s2803_s1] sm:$0xff]  ;;  %s1878_s1 = smov [#allocation8]  }
 0x1a2   :  { %v2485_v24 = vpop.permute.xlu0 %1144  ;;  %v1048_v6 = vsel %vm1046_vm11, %v2467_v9, %v1045_v40  ;;  %v1136_v9 = vsub.f32 %v2326_v1, %v2450_v25 }
 0x1a3   :  { %v1686_v5 = vpop.eup %1685  ;;  %v1152_v46 = vsub.f32 %v1133_v53, %v1141_v59  ;;  %v1401_v53 = vld [vmem:[%s2804_s2] sm:$0xf]  ;;  %s1612_s2 = sshll.u32 %s1878_s1, 4  ;;  %s1613_s2 = int_to_ptr.vmem [resolvable:$true] %s1612_s2 }
 0x1a4   :  { %608 = vrot.lane.b32.xlu0 %v1686_v5, %s1857_s3  ;;  %v1688_v49 = vpop.eup %1687  ;;  %v1056_v5 = vsub.f32 %v2326_v1, %v1045_v40  ;;  %s1829_s22 = scalar_lea.vmem %s1613_s2, 384  ;;  %p1834_p11 = scmp.lt.s32.totalorder %s1613_s2, %s1613_s2 }
 0x1a5   :  { %v1143_v7 = vpop.permute.xlu1 %1142  ;;  %p1830_p10 = scmp.ne.s32.totalorder %s1613_s2, %s1829_s22  ;;  %p1835_p12 = scmp.lt.s32.totalorder %s1829_s22, %s1829_s22 }
 0x1a6   :  { %v1147_v43 = vsel %vm1126_vm10, %v1143_v7, %v2485_v24  ;;  %v1063_v11 = vpop.permute.xlu0 %1062  ;;  %v1146_v33 = vsel %vm1126_vm10, %v1141_v59, %v1143_v7  ;;  %v1055_v59 = vsub.f32 %v2345_v37, %v1048_v6  ;;  %v428_v6 = vsel %vm420_vm9, %v2287_v38, -inf }
 0x1a7   :  { %v1154_v41 = vsub.f32 %v1135_v2, %v1147_v43  ;;  %v1156_v43 = vmul.f32 1.442695, %v1152_v46  ;;  %p1836_p13 = por %p1835_p12, %p1834_p11 }
 0x1a8   :  { %v1690_v56 = vpop.eup %1689  ;;  %1010 = vrot.lane.b32.xlu0 %v1688_v49, %s1862_s7  ;;  %v1153_v49 = vsub.f32 %v1134_v55, %v1146_v33  ;;  %v421_v55 = vsel %vm420_vm9, %v2264_v18, -inf }
 0x1a9   :  { %v1160_v17 = vmul.f32 1.442695, %v1154_v41  ;;  %v1061_v42 = vpop.permute.xlu1 %1060  ;;  %612 = vrot.lane.b32.xlu1 %v1690_v56, %s1857_s3  ;;  %v1692_v12 = vpop.eup %1691  ;;  %p1837_p0 = pnand %p1836_p13, %p1830_p10 }
 0x1aa   :  { %v1066_v62 = vsel %vm1046_vm11, %v1061_v42, %v1063_v11  ;;  %v1694_v61 = vpop.eup %1693  ;;  %v1072_v47 = vsub.f32 %v1053_v48, %v1061_v42  ;;  %v1158_v41 = vmul.f32 1.442695, %v1153_v49  ;;  %v422_v49 = vrot.slane %v421_v55, 4 }
 0x1ab   :  { %v1073_v45 = vsub.f32 %v1054_v8, %v1066_v62  ;;  %1703 = vpow2.f32 %v1160_v17  ;;  %v1696_v21 = vpop.eup %1695  ;;  %v1155_v8 = vsub.f32 %v1136_v9, %v2485_v24 }
 0x1ac   :  { %932 = vrot.lane.b32.xlu0 %v1692_v12, %s1861_s6  ;;  %1705 = vpow2.f32 %v598_v3  ;;  %v1698_v2 = vpop.eup %1697  ;;  %v1076_v16 = vmul.f32 1.442695, %v1072_v47  ;;  %v1186_v12 = vld [vmem:[#allocation3 + $0x8] sm:$0xff]  ;;  %v1874_v47 = vmov 0  }
 0x1ad   :  { %v1078_v4 = vmul.f32 1.442695, %v1073_v45  ;;  %v1065_v50 = vpop.permute.xlu1 %1064  ;;  %774 = vrot.lane.b32.xlu1 %v1694_v61, %s1859_s29  ;;  %v1700_v32 = vpop.eup %1699  ;;  %v1162_v3 = vmul.f32 1.442695, %v1155_v8  ;;  %1625 = vmatprep.mubr.msk.f32.mxu0 %vm1241_vm12, %v1186_v12 }
 0x1ae   :  { %v1075_v58 = vsub.f32 %v1056_v5, %v1065_v50  ;;  %v1067_v23 = vsel %vm1046_vm11, %v1063_v11, %v1065_v50  ;;  %v1702_v54 = vpop.eup %1701  ;;  %1626 = vmatprep.mubr.msk.f32.mxu1 %vm1241_vm12, %v1186_v12  ;;  %1654 = vset.pattern.permute.xlu1 %v1874_v47  ;;  %v1876_v50 = vmov 2  }
 0x1af   :  { %1707 = vpow2.f32 %v1078_v4  ;;  %v1074_v56 = vsub.f32 %v1055_v59, %v1067_v23  ;;  %1653 = vset.pattern.permute.xlu0 %v1874_v47  ;;  %v1875_v4 = vmov 1   ;;  %v2856_v23 = vmov 0.0  }
 0x1b0   :  { %850 = vrot.lane.b32.xlu0 %v1696_v21, %s1860_s30  ;;  %1709 = vpow2.f32 %v682_v39  ;;  %v1082_v7 = vmul.f32 1.442695, %v1075_v58  ;;  %v1877_v39 = vmov 3   ;;  %v406_v58 = vsel %vm398_vm8, %v2287_v38, -inf }
 0x1b1   :  { %614 = vrot.lane.b32.xlu1 %v1698_v2, %s1857_s3  ;;  %1711 = vpow2.f32 %v1076_v16  ;;  %v1080_v11 = vmul.f32 1.442695, %v1074_v56  ;;  %v399_v2 = vsel %vm398_vm8, %v2264_v18, -inf  ;;  %v407_v59 = vrot.slane %v406_v58, 4 }
 0x1b2   :  { %1713 = vpow2.f32 %v1156_v43  ;;  %v400_v43 = vrot.slane %v399_v2, 4  ;;  %v423_v18 = vmax.f32 %v421_v55, %v422_v49  ;;  %v413_v56 = vsel %vm398_vm8, %v2284_v35, -inf }
 0x1b3   :  { %1715 = vpow2.f32 %v1082_v7  ;;  %v429_v7 = vrot.slane %v428_v6, 4  ;;  %v408_v9 = vmax.f32 %v406_v58, %v407_v59  ;;  %v523_v55 = vsub.f32 %v2359_v14, %v2143_v51 }
 0x1b4   :  { %770 = vrot.lane.b32.xlu0 %v1700_v32, %s1859_s29  ;;  %1717 = vpow2.f32 %v1158_v41  ;;  %v401_v41 = vmax.f32 %v399_v2, %v400_v43  ;;  %v522_v58 = vsub.f32 %v2319_v60, %v2148_v52 }
 0x1b5   :  { %1719 = vpow2.f32 %v1080_v11  ;;  %v430_v38 = vmax.f32 %v428_v6, %v429_v7  ;;  %v524_v7 = vsub.f32 %v2345_v37, %v2161_v57 }
 0x1b6   :  { %1721 = vpow2.f32 %v1162_v3  ;;  %v402_v11 = vrot.slane %v401_v41, 2  ;;  %v409_v3 = vrot.slane %v408_v9, 2  ;;  %v525_v51 = vsub.f32 %v522_v58, %v1944_v22 }
 0x1b7   :  { %v527_v57 = vsub.f32 %v524_v7, %v1940_v20 }
 0x1b8   :  { %690 = vrot.lane.b32.xlu0 %v1702_v54, %s1858_s4  ;;  %v1704_v40 = vpop.eup %1703  ;;  %v435_v54 = vsel %vm420_vm9, %v2284_v35, -inf }
 0x1b9   :  { %1172 = vrot.lane.b32.xlu1 %v1704_v40, %s1864_s9  ;;  %v1706_v17 = vpop.eup %1705  ;;  %v414_v40 = vrot.slane %v413_v56, 4  ;;  %v436_v8 = vrot.slane %v435_v54, 4 }
 0x1bc   :  { %v1708_v42 = vpop.eup %1707  ;;  %610 = vrot.lane.b32.xlu0 %v1706_v17, %s1857_s3  ;;  %v424_v17 = vrot.slane %v423_v18, 2 }
 0x1bd   :  { %1090 = vrot.lane.b32.xlu1 %v1708_v42, %s1863_s8  ;;  %v1710_v48 = vpop.eup %1709 }
 0x1be   :  { %v1712_v1 = vpop.eup %1711  ;;  %v425_v12 = vmax.f32 %v423_v18, %v424_v17 }
 0x1bf   :  { %v1714_v25 = vpop.eup %1713 }
 0x1c0   :  { %694 = vrot.lane.b32.xlu0 %v1710_v48, %s1858_s4  ;;  %v1716_v24 = vpop.eup %1715  ;;  %v431_v48 = vrot.slane %v430_v38, 2 }
 0x1c1   :  { %1088 = vrot.lane.b32.xlu1 %v1712_v1, %s1863_s8  ;;  %v1718_v62 = vpop.eup %1717 }
 0x1c2   :  { %v1720_v45 = vpop.eup %1719 }
 0x1c3   :  { %v1722_v61 = vpop.eup %1721 }
 0x1c4   :  { %1168 = vrot.lane.b32.xlu0 %v1714_v25, %s1864_s9  ;;  %v415_v25 = vmax.f32 %v413_v56, %v414_v40 }
 0x1c5   :  { %1094 = vrot.lane.b32.xlu1 %v1716_v24, %s1863_s8  ;;  %v437_v24 = vmax.f32 %v435_v54, %v436_v8  ;;  %v526_v54 = vsub.f32 %v523_v55, %v2003_v26  ;;  %v528_v8 = vmul.f32 1.442695, %v525_v51 }
 0x1c6   :  { %v416_v35 = vrot.slane %v415_v25, 2 }
 0x1c7   :  { %v438_v47 = vrot.slane %v437_v24, 2  ;;  %1723 = vpow2.f32 %v528_v8 }
 0x1c8   :  { %1170 = vrot.lane.b32.xlu0 %v1718_v62, %s1864_s9  ;;  %v403_v62 = vmax.f32 %v401_v41, %v402_v11  ;;  %v417_v6 = vmax.f32 %v415_v25, %v416_v35 }
 0x1c9   :  { %1414 = vperm.xlu1 %1654, %v1401_v53  }
 0x1ca   :  { %v418_v52 = vrot.slane %v417_v6, 1 }
 0x1cc   :  { %1092 = vrot.lane.b32.xlu0 %v1720_v45, %s1863_s8  ;;  %v2607_v11 = vmax.f32 %v417_v6, %v418_v52 }
 0x1cd   :  { %1655 = vset.pattern.permute.xlu1 %v1875_v4  ;;  %v426_v4 = vrot.slane %v425_v12, 1 }
 0x1ce   :  { %1433 = vperm.xlu1 %1655, %v1401_v53  }
 0x1cf   :  { %v2576_v49 = vmax.f32 %v425_v12, %v426_v4 }
 0x1d0   :  { %1174 = vrot.lane.b32.xlu0 %v1722_v61, %s1864_s9  ;;  %v410_v61 = vmax.f32 %v408_v9, %v409_v3  ;;  %v530_v3 = vmul.f32 1.442695, %v526_v54 }
 0x1d2   :  { %1657 = vset.pattern.permute.xlu1 %v1877_v39  ;;  %1725 = vpow2.f32 %v530_v3 }
 0x1d3   :  { %1477 = vperm.xlu1 %1657, %v1401_v53  }
 0x1d4   :  { %1395 = vperm.xlu0 %1653, %v1392_v36   ;;  %v404_v36 = vrot.slane %v403_v62, 1 }
 0x1d6   :  { %v2574_v43 = vmax.f32 %v403_v62, %v404_v36  ;;  %v532_v62 = vmul.f32 1.442695, %v527_v57 }
 0x1d8   :  { %1656 = vset.pattern.permute.xlu0 %v1876_v50  ;;  %v2592_v14 = vsel %vm398_vm8, %v2574_v43, %v2576_v49  ;;  %1727 = vpow2.f32 %v532_v62  ;;  %v2860_v62 = vld [vmem:[#allocation27_spill] sm:$0xff] }
 0x1d9   :  { %1455 = vperm.xlu0 %1656, %v1401_v53   ;;  %v432_v53 = vmax.f32 %v430_v38, %v431_v48  ;;  %v540_v40 = vsub.f32 %v2190_v13, %v2592_v14  ;;  %v1108_v48 = vsub.f32 %v2252_v63, %v2592_v14  ;;  %v868_v55 = vsub.f32 %v2121_v34, %v2592_v14 }
 0x1db   :  { %v433_v2 = vrot.slane %v432_v53, 1  ;;  %v543_v35 = vmul.f32 1.442695, %v540_v40  ;;  %v871_v57 = vmul.f32 1.442695, %v868_v55  ;;  %v2858_v40 = vld [vmem:[#allocation16_spill] sm:$0xff] }
 0x1dd   :  { %1658 = vset.pattern.permute.xlu0 %v1877_v39  ;;  %v2584_v18 = vmax.f32 %v432_v53, %v433_v2  ;;  %1729 = vpow2.f32 %v543_v35  ;;  %v2861_v35 = vld [vmem:[#allocation19_spill] sm:$0xff] }
 0x1e1   :  { %v1009_v42 = vpop.permute.xlu0 %1008 }
 0x1e4   :  { %v2539_v46 = vpop.permute.xlu1 %928 }
 0x1e8   :  { %v1015_v5 = vpop.permute.xlu1 %1014 }
 0x1ec   :  { %v2541_v21 = vpop.permute.xlu1 %934 }
 0x1f3   :  { %v2564_v45 = vpop.permute.xlu0 %848 }
 0x1f7   :  { %v2543_v33 = vpop.permute.xlu1 %854 }
 0x1fb   :  { %v2549_v16 = vpop.permute.xlu1 %1012 }
 0x1fc   :  { %v1018_v32 = vsel %vm292_vm5, %v2549_v16, %v1015_v5  ;;  %v411_v5 = vrot.slane %v410_v61, 1 }
 0x1fd   :  { %1317 = vmatpush1.msra.mxu1 %v1018_v32  ;;  %v439_v32 = vmax.f32 %v437_v24, %v438_v47  ;;  %v1111_v47 = vmul.f32 1.442695, %v1108_v48  ;;  %v2859_v48 = vld [vmem:[#allocation32_spill] sm:$0xff] }
 0x1fe   :  { %1318 = vmatprep.subr.mxu1 %v2856_v23  ;;  %v2582_v41 = vmax.f32 %v410_v61, %v411_v5 }
 0x1ff   :  { %v2562_v1 = vpop.permute.xlu1 %930  ;;  %v2568_v39 = vpop.permute.xlu0 %768  ;;  %v440_v60 = vrot.slane %v439_v32, 1  ;;  %1731 = vpow2.f32 %v1111_v47 }
 0x200   :  { %v2601_v37 = vsel %vm398_vm8, %v2582_v41, %v2584_v18 }
 0x201   :  { %v2609_v17 = vmax.f32 %v439_v32, %v440_v60  ;;  %v629_v25 = vsub.f32 %v2215_v28, %v2601_v37  ;;  %v1109_v53 = vsub.f32 %v2267_v19, %v2601_v37  ;;  %v1029_v63 = vsub.f32 %v2273_v30, %v2601_v37 }
 0x202   :  { %v949_v19 = vsub.f32 %v2114_v27, %v2601_v37  ;;  %v948_v30 = vsub.f32 %v2106_v10, %v2592_v14  ;;  %v936_v27 = vsel %vm254_vm4, %v2539_v46, %v2562_v1  ;;  %v869_v6 = vsub.f32 %v2132_v44, %v2601_v37 }
 0x203   :  { %v2566_v50 = vpop.permute.xlu1 %852  ;;  %v2627_v28 = vsel %vm398_vm8, %v2607_v11, %v2609_v17  ;;  %v1113_v2 = vmul.f32 1.442695, %v1109_v53  ;;  %v1033_v58 = vmul.f32 1.442695, %v1029_v63 }
 0x204   :  { %v1110_v10 = vsub.f32 %v2270_v29, %v2627_v28  ;;  %v953_v46 = vmul.f32 1.442695, %v949_v19  ;;  %v789_v29 = vsub.f32 %v2199_v15, %v2601_v37  ;;  %v1030_v52 = vsub.f32 %v2276_v31, %v2627_v28 }
 0x205   :  { %v873_v15 = vmul.f32 1.442695, %v869_v6  ;;  %v950_v8 = vsub.f32 %v2858_v40, %v2627_v28 }
 0x206   :  { %v1115_v44 = vmul.f32 1.442695, %v1110_v10 }
 0x207   :  { %v2586_v56 = vpop.permute.xlu1 %772 }
 0x20b   :  { %v2578_v59 = vpop.permute.xlu0 %688 }
 0x213   :  { %v2603_v38 = vpop.permute.xlu1 %692 }
 0x216   :  { %v2595_v9 = vpop.permute.xlu0 %608 }
 0x21a   :  { %v1011_v24 = vpop.permute.xlu0 %1010 }
 0x21b   :  { %v2615_v12 = vpop.permute.xlu1 %612  ;;  %v1017_v61 = vsel %vm292_vm5, %v1011_v24, %v2549_v16  ;;  %v1016_v13 = vsel %vm292_vm5, %v1009_v42, %v1011_v24  ;;  %v1028_v16 = vsub.f32 %v2255_v0, %v2592_v14  ;;  %v633_v42 = vmul.f32 1.442695, %v629_v25 }
 0x21c   :  { %1245 = vmatprep.subr.mxu0 %v1017_v61  ;;  %v709_v25 = vsub.f32 %v2859_v48, %v2601_v37  ;;  %v1035_v24 = vmul.f32 1.442695, %v1030_v52  ;;  %v708_v61 = vsub.f32 %v2860_v62, %v2592_v14  ;;  %v496_v48 = vsub.f32 %v1940_v20, %v2627_v28 }
 0x21d   :  { %1246 = vmatpush1.msra.mxu0 %v1016_v13  ;;  %v1031_v34 = vmul.f32 1.442695, %v1028_v16  ;;  %1733 = vpow2.f32 %v633_v42  ;;  %v1724_v13 = vpop.eup %1723  ;;  %v2862_v16 = vld [vmem:[#allocation26_spill] sm:$0xff] }
 0x21e   :  { %v933_v36 = vpop.permute.xlu0 %932  ;;  %1735 = vpow2.f32 %v1113_v2  ;;  %v1726_v63 = vpop.eup %1725  ;;  %v628_v42 = vsub.f32 %v2862_v16, %v2592_v14  ;;  %v713_v2 = vmul.f32 1.442695, %v709_v25  ;;  %v711_v55 = vmul.f32 1.442695, %v708_v61 }
 0x21f   :  { %v937_v4 = vsel %vm254_vm4, %v2562_v1, %v933_v36  ;;  %v938_v5 = vsel %vm254_vm4, %v933_v36, %v2541_v21  ;;  %v775_v0 = vpop.permute.xlu1 %774  ;;  %v858_v21 = vsel %vm216_vm3, %v2566_v50, %v2543_v33  ;;  %v951_v1 = vmul.f32 1.442695, %v948_v30  ;;  %v2863_v36 = vld [vmem:[#allocation25_spill] sm:$0xff]  ;;  %v2682_v30 = vpop.eup %1727 }
 0x220   :  { %1247 = vmatprep.subr.mxu0 %v937_v4  ;;  %1319 = vmatpush1.msra.mxu1 %v938_v5  ;;  %v778_v33 = vsel %vm178_vm2, %v2586_v56, %v775_v0  ;;  %1737 = vpow2.f32 %v1033_v58  ;;  %v790_v19 = vsub.f32 %v2863_v36, %v2627_v28  ;;  %v2864_v0 = vld [vmem:[#allocation28_spill] sm:$0xff]  ;;  %v2690_v58 = vpop.eup %1729 }
 0x221   :  { %1248 = vmatpush1.msra.mxu0 %v936_v27  ;;  %1320 = vmatprep.subr.mxu1 %v2856_v23  ;;  %1739 = vpow2.f32 %v1031_v34  ;;  %v541_v27 = vsub.f32 %v2864_v0, %v2601_v37  ;;  %v1732_v34 = vpop.eup %1731 }
 0x222   :  { %1321 = vmatpush1.msra.mxu1 %v858_v21  ;;  %v851_v32 = vpop.permute.xlu0 %850  ;;  %1741 = vpow2.f32 %v953_v46  ;;  %v495_v21 = vsub.f32 %v2003_v26, %v2601_v37  ;;  %v2865_v46 = vld [vmem:[#allocation31_spill] sm:$0xff]  ;;  %v494_v26 = vsub.f32 %v1944_v22, %v2592_v14 }
 0x223   :  { %1322 = vmatprep.subr.mxu1 %v2856_v23  ;;  %v857_v7 = vsel %vm216_vm3, %v851_v32, %v2566_v50  ;;  %v856_v51 = vsel %vm216_vm3, %v2564_v45, %v851_v32  ;;  %v2857_v50 = vld [vmem:[#allocation24_spill] sm:$0xff]  ;;  %v793_v45 = vmul.f32 1.442695, %v789_v29  ;;  %1743 = vpow2.f32 %v951_v1 }
 0x224   :  { %1249 = vmatprep.subr.mxu0 %v857_v7  ;;  %1323 = vmatpush1.msra.mxu1 %v778_v33  ;;  %v788_v60 = vsub.f32 %v2857_v50, %v2592_v14  ;;  %1745 = vpow2.f32 %v1115_v44  ;;  %v795_v32 = vmul.f32 1.442695, %v790_v19  ;;  %v710_v1 = vsub.f32 %v2865_v46, %v2627_v28 }
 0x225   :  { %1250 = vmatpush1.msra.mxu0 %v856_v51  ;;  %1324 = vmatprep.subr.mxu1 %v2856_v23  ;;  %1747 = vpow2.f32 %v873_v15  ;;  %v2866_v51 = vld [vmem:[#allocation30_spill] sm:$0xff]  ;;  %v545_v52 = vmul.f32 1.442695, %v541_v27  ;;  %v499_v50 = vmul.f32 1.442695, %v495_v21 }
 0x226   :  { %v771_v54 = vpop.permute.xlu0 %770  ;;  %v791_v53 = vmul.f32 1.442695, %v788_v60  ;;  %1749 = vpow2.f32 %v871_v57  ;;  %v630_v44 = vsub.f32 %v2866_v51, %v2627_v28 }
 0x227   :  { %v777_v3 = vsel %vm178_vm2, %v771_v54, %v2586_v56  ;;  %v776_v31 = vsel %vm178_vm2, %v2568_v39, %v771_v54  ;;  %v870_v56 = vsub.f32 %v2861_v35, %v2627_v28  ;;  %v955_v39 = vmul.f32 1.442695, %v950_v8  ;;  %v615_v54 = vpop.permute.xlu1 %614 }
 0x228   :  { %1251 = vmatprep.subr.mxu0 %v777_v3  ;;  %1751 = vpow2.f32 %v793_v45  ;;  %v2867_v45 = vld [vmem:[#allocation29_spill] sm:$0xff]  ;;  %v497_v8 = vmul.f32 1.442695, %v494_v26 }
 0x229   :  { %1252 = vmatpush1.msra.mxu0 %v776_v31  ;;  %1753 = vpow2.f32 %v1035_v24  ;;  %v875_v10 = vmul.f32 1.442695, %v870_v56  ;;  %v542_v22 = vsub.f32 %v2867_v45, %v2627_v28  ;;  %v635_v31 = vmul.f32 1.442695, %v630_v44 }
 0x22a   :  { %v691_v47 = vpop.permute.xlu0 %690  ;;  %1755 = vpow2.f32 %v791_v53  ;;  %v2696_v29 = vpop.eup %1733  ;;  %v618_v24 = vsel %vm98_vm0, %v2615_v12, %v615_v54  ;;  %v501_v28 = vmul.f32 1.442695, %v496_v48 }
 0x22b   :  { %v697_v4 = vsel %vm140_vm1, %v691_v47, %v2603_v38  ;;  %v696_v5 = vsel %vm140_vm1, %v2578_v59, %v691_v47  ;;  %1757 = vpow2.f32 %v955_v39  ;;  %v631_v59 = vmul.f32 1.442695, %v628_v42  ;;  %v1736_v37 = vpop.eup %1735  ;;  %v2719_v53 = vpop.permute.xlu1 %1172 }
 0x22c   :  { %1253 = vmatprep.subr.mxu0 %v697_v4  ;;  %1759 = vpow2.f32 %v713_v2  ;;  %v547_v61 = vmul.f32 1.442695, %v542_v22  ;;  %v2868_v22 = vld [vmem:[#allocation20_spill] sm:$0xff] }
 0x22d   :  { %1254 = vmatpush1.msra.mxu0 %v696_v5  ;;  %1761 = vpow2.f32 %v711_v55  ;;  %v1738_v15 = vpop.eup %1737 }
 0x22e   :  { %v611_v6 = vpop.permute.xlu0 %610  ;;  %1763 = vpow2.f32 %v875_v10  ;;  %v1740_v60 = vpop.eup %1739 }
 0x22f   :  { %v617_v7 = vsel %vm98_vm0, %v611_v6, %v2615_v12  ;;  %v616_v33 = vsel %vm98_vm0, %v2595_v9, %v611_v6  ;;  %1765 = vpow2.f32 %v631_v59  ;;  %v715_v9 = vmul.f32 1.442695, %v710_v1  ;;  %v1742_v14 = vpop.eup %1741  ;;  %v1091_v36 = vpop.permute.xlu1 %1090  ;;  %v1185_v6 = vld [vmem:[#allocation3] sm:$0xff] }
 0x230   :  { %1255 = vmatprep.subr.mxu0 %v617_v7  ;;  %1767 = vpow2.f32 %v795_v32  ;;  %v1744_v3 = vpop.eup %1743  ;;  %vm1408_vm0 = vcmask 1041408  }
 0x231   :  { %1256 = vmatpush1.msra.mxu0 %v616_v33  ;;  %1769 = vpow2.f32 %v545_v52  ;;  %v1746_v25 = vpop.eup %1745 }
 0x232   :  { %1257 = vmatprep.subr.mxu0 %v1726_v63  ;;  %v695_v57 = vpop.permute.xlu0 %694  ;;  %1771 = vpow2.f32 %v499_v50  ;;  %v1748_v62 = vpop.eup %1747 }
 0x233   :  { %1258 = vmatpush1.msra.mxu0 %v1724_v13  ;;  %v698_v40 = vsel %vm140_vm1, %v2603_v38, %v695_v57  ;;  %1773 = vpow2.f32 %v715_v9  ;;  %v1750_v13 = vpop.eup %1749  ;;  %v1089_v27 = vpop.permute.xlu1 %1088 }
 0x234   :  { %1259 = vmatprep.subr.mxu0 %v1736_v37  ;;  %1325 = vmatpush1.msra.mxu1 %v698_v40  ;;  %1775 = vpow2.f32 %v497_v8  ;;  %v1096_v32 = vsel %vm330_vm6, %v1089_v27, %v1091_v36 }
 0x235   :  { %1260 = vmatpush1.msra.mxu0 %v1732_v34  ;;  %1326 = vmatprep.subr.mxu1 %v2856_v23  ;;  %v1752_v20 = vpop.eup %1751  ;;  %1777 = vpow2.f32 %v635_v31 }
 0x236   :  { %1327 = vmatpush1.msra.mxu1 %v618_v24  ;;  %v2715_v38 = vpop.permute.xlu0 %1168  ;;  %1261 = vmatprep.subr.mxu0 %v1738_v15  ;;  %v1754_v12 = vpop.eup %1753  ;;  %1779 = vpow2.f32 %v547_v61 }
 0x237   :  { %1262 = vmatpush1.msra.mxu0 %v1740_v60  ;;  %1328 = vmatprep.subr.mxu1 %v2856_v23  ;;  %v1756_v35 = vpop.eup %1755  ;;  %1781 = vpow2.f32 %v501_v28 }
 0x238   :  { %1263 = vmatprep.subr.mxu0 %v1742_v14  ;;  %1329 = vmatpush1.msra.mxu1 %v2682_v30  ;;  %v1758_v56 = vpop.eup %1757 }
 0x239   :  { %1264 = vmatpush1.msra.mxu0 %v1744_v3  ;;  %1330 = vmatprep.subr.mxu1 %v2856_v23  ;;  %v1760_v63 = vpop.eup %1759  ;;  %v2869_v3 = vld [vmem:[#allocation21_spill] sm:$0xff] }
 0x23a   :  { %1331 = vmatpush1.msra.mxu1 %v1746_v25  ;;  %1265 = vmatprep.subr.mxu0 %v1748_v62  ;;  %v1171_v47 = vpop.permute.xlu0 %1170  ;;  %v1762_v39 = vpop.eup %1761  ;;  %v2870_v25 = vld [vmem:[#allocation17_spill] sm:$0xff] }
 0x23b   :  { %1266 = vmatpush1.msra.mxu0 %v1750_v13  ;;  %1332 = vmatprep.subr.mxu1 %v2856_v23  ;;  %v1764_v16 = vpop.eup %1763  ;;  %v1177_v10 = vsel %vm368_vm7, %v1171_v47, %v2719_v53  ;;  %v1176_v21 = vsel %vm368_vm7, %v2715_v38, %v1171_v47 }
 0x23c   :  { %1267 = vmatprep.subr.mxu0 %v1752_v20  ;;  %1333 = vmatpush1.msra.mxu1 %v1754_v12  ;;  %v1766_v42 = vpop.eup %1765  ;;  %v2871_v20 = vld [vmem:[#allocation18_spill] sm:$0xff] }
 0x23d   :  { %1268 = vmatpush1.msra.mxu0 %v1756_v35  ;;  %1334 = vmatprep.subr.mxu1 %v2856_v23  ;;  %v1768_v19 = vpop.eup %1767  ;;  %v2872_v35 = vld [vmem:[#allocation15_spill] sm:$0xff] }
 0x23e   :  { %1335 = vmatpush1.msra.mxu1 %v1758_v56  ;;  %1269 = vmatprep.subr.mxu0 %v1760_v63  ;;  %v1770_v30 = vpop.eup %1769  ;;  %v1093_v5 = vpop.permute.xlu0 %1092 }
 0x23f   :  { %1270 = vmatpush1.msra.mxu0 %v1762_v39  ;;  %1336 = vmatprep.subr.mxu1 %v2856_v23  ;;  %v1772_v4 = vpop.eup %1771 }
 0x240   :  { %1271 = vmatprep.subr.mxu0 %v2696_v29  ;;  %1337 = vmatpush1.msra.mxu1 %v1764_v16  ;;  %v1774_v2 = vpop.eup %1773  ;;  %v1095_v29 = vpop.permute.xlu1 %1094  ;;  %v2874_v16 = vld [vmem:[#allocation23_spill] sm:$0xff] }
 0x241   :  { %1272 = vmatpush1.msra.mxu0 %v1766_v42  ;;  %1338 = vmatprep.subr.mxu1 %v2856_v23  ;;  %v1776_v55 = vpop.eup %1775  ;;  %v1098_v7 = vsel %vm330_vm6, %v1093_v5, %v1095_v29 }
 0x242   :  { %1339 = vmatpush1.msra.mxu1 %v1768_v19  ;;  %1273 = vmatprep.subr.mxu0 %v1770_v30  ;;  %v1778_v0 = vpop.eup %1777  ;;  %v1175_v59 = vpop.permute.xlu0 %1174  ;;  %v2875_v30 = vld [vmem:[#allocation14_spill] sm:$0xff] }
 0x243   :  { %1274 = vmatpush1.msra.mxu0 %v2690_v58  ;;  %1340 = vmatprep.subr.mxu1 %v2856_v23  ;;  %v1780_v34 = vpop.eup %1779  ;;  %v1097_v58 = vsel %vm330_vm6, %v1091_v36, %v1093_v5  ;;  %v1178_v1 = vsel %vm368_vm7, %v2719_v53, %v1175_v59 }
 0x244   :  { %1275 = vmatprep.subr.mxu0 %v1772_v4  ;;  %1341 = vmatpush1.msra.mxu1 %v1774_v2  ;;  %v1782_v46 = vpop.eup %1781  ;;  %v2743_v50 = vpop.permute.xlu1 %1414 }
 0x245   :  { %1276 = vmatpush1.msra.mxu0 %v1776_v55  ;;  %1342 = vmatprep.subr.mxu1 %v2856_v23 }
 0x246   :  { %1305 = vmatprep.subr.mxu0 %v1177_v10  ;;  %1343 = vmatpush1.msra.mxu1 %v1778_v0 }
 0x247   :  { %1306 = vmatpush2.msra.mxu0 %v1176_v21  ;;  %1344 = vmatprep.subr.mxu1 %v2856_v23 }
 0x248   :  { %1307 = vmatprep.subr.mxu0 %v1097_v58  ;;  %1345 = vmatpush1.msra.mxu1 %v1780_v34 }
 0x249   :  { %1308 = vmatpush2.msra.mxu0 %v1096_v32  ;;  %1346 = vmatprep.subr.mxu1 %v2856_v23  ;;  %v1434_v61 = vpop.permute.xlu1 %1433 }
 0x24a   :  { %1310 = vmatmul.mubr.f32.vlgmr.msra.gmra.mxu0 %v1185_v6  ;;  %1347 = vmatpush1.msra.mxu1 %v1782_v46 }
 0x24b   :  { %1376 = vmatprep.subr.mxu1 %v2856_v23 }
 0x24c   :  { %1377 = vmatpush2.msra.mxu1 %v1178_v1 }
 0x24d   :  { %1378 = vmatprep.subr.mxu1 %v2856_v23 }
 0x24e   :  { %1379 = vmatpush2.msra.mxu1 %v1098_v7  ;;  %v1478_v27 = vpop.permute.xlu1 %1477 }
 0x24f   :  { %1381 = vmatmul.mubr.f32.vlgmr.msra.gmra.mxu1 %v1185_v6  ;;  %v1396_v52 = vpop.permute.xlu0 %1395 }
 0x30a   :  { %v1311_v33 = vpop.f32.mrf.mxu0 }
 0x30b   :  { %1783 = vlog2.f32 %v1311_v33 }
 0x30c   :  { %v1313_v26 = vpop.f32.mrf.mxu0 }
 0x30d   :  { %1785 = vlog2.f32 %v1313_v26 }
 0x30f   :  { %v1382_v37 = vpop.f32.mrf.mxu1 }
 0x310   :  { %1787 = vlog2.f32 %v1382_v37 }
 0x311   :  { %v1384_v51 = vpop.f32.mrf.mxu1 }
 0x318   :  { %v1784_v44 = vpop.eup %1783 }
 0x319   :  { %v1387_v15 = vmul.f32 0.6931472, %v1784_v44  ;;  %v2876_v44 = vld [vmem:[#allocation13_spill] sm:$0xff] }
 0x31a   :  { %v1786_v60 = vpop.eup %1785 }
 0x31b   :  { %v1389_v54 = vmul.f32 0.6931472, %v1786_v60  ;;  %v1398_v57 = vadd.f32 %v1396_v52, %v1387_v15  ;;  %v2877_v15 = vld [vmem:[#allocation12_spill] sm:$0xff] }
 0x31d   :  { %v1788_v23 = vpop.eup %1787  ;;  %v1399_v9 = vadd.f32 %v1396_v52, %v1389_v54  ;;  %v1402_v45 = vadd.f32 %v1398_v57, %v2574_v43  ;;  %v1405_v14 = vadd.f32 %v1398_v57, %v2868_v22  ;;  %v1504_v40 = vadd.f32 %v1398_v57, %v2576_v49 }
 0x31e   :  { %v1391_v8 = vmul.f32 0.6931472, %v1788_v23  ;;  %v1507_v31 = vadd.f32 %v1398_v57, %v2869_v3 }
 0x31f   :  { %v1403_v48 = vadd.f32 %v1399_v9, %v2582_v41  ;;  %v1406_v24 = vadd.f32 %v1399_v9, %v2870_v25  ;;  %v1409_v62 = vsel %vm1408_vm0, %v1402_v45, %v1405_v14  ;;  %v1505_v38 = vadd.f32 %v1399_v9, %v2584_v18  ;;  %v2873_v41 = vld [vmem:[#allocation22_spill] sm:$0xff]  ;;  %v1456_v14 = vpop.permute.xlu0 %1455 }
 0x320   :  { %v1400_v13 = vadd.f32 %v1396_v52, %v1391_v8  ;;  %v1508_v28 = vadd.f32 %v1399_v9, %v2871_v20  ;;  %v1513_v43 = vrot.slane %v1504_v40, 4  ;;  %v1522_v12 = vrot.slane %v1507_v31, 4 }
 0x321   :  { %v1410_v53 = vsel %vm1408_vm0, %v1403_v48, %v1406_v24  ;;  %v1514_v49 = vrot.slane %v1505_v38, 4  ;;  %v1439_v56 = vrot.slane %v1409_v62, %v2872_v35  ;;  %v1483_v4 = vrot.slane %v1409_v62, %v2875_v30 }
 0x322   :  { %v1404_v63 = vadd.f32 %v1400_v13, %v2607_v11  ;;  %v1407_v47 = vadd.f32 %v1400_v13, %v2873_v41  ;;  %v1506_v39 = vadd.f32 %v1400_v13, %v2609_v17  ;;  %v1509_v42 = vadd.f32 %v1400_v13, %v2874_v16 }
 0x323   :  { %v1523_v18 = vrot.slane %v1508_v28, 4  ;;  %v2761_v36 = vsel %vm1408_vm0, %v1513_v43, %v1522_v12  ;;  %v1443_v19 = vrot.slane %v1410_v53, %v2872_v35  ;;  %v1487_v10 = vrot.slane %v1410_v53, %v2875_v30 }
 0x324   :  { %v1411_v5 = vsel %vm1408_vm0, %v1404_v63, %v1407_v47  ;;  %v1515_v2 = vrot.slane %v1506_v39, 4  ;;  %v1524_v55 = vrot.slane %v1509_v42, 4  ;;  %v1549_v11 = vrot.slane %v2761_v36, %v2872_v35 }
 0x325   :  { %v1529_v0 = vsel %vm1408_vm0, %v1514_v49, %v1523_v18  ;;  %v1447_v17 = vrot.slane %v1411_v5, %v2872_v35  ;;  %v1448_v34 = vmul.f32 %v1439_v56, %v1434_v61  ;;  %v1491_v6 = vrot.slane %v1411_v5, %v2875_v30 }
 0x326   :  { %v1530_v21 = vsel %vm1408_vm0, %v1515_v2, %v1524_v55  ;;  %v1553_v58 = vrot.slane %v1529_v0, %v2872_v35  ;;  %v1449_v59 = vmul.f32 %v1443_v19, %v1434_v61  ;;  %v1558_v1 = vmul.f32 %v1549_v11, %v1434_v61 }
 0x327   :  { %v1450_v32 = vmul.f32 %v1447_v17, %v1434_v61  ;;  %v1557_v46 = vrot.slane %v1530_v21, %v2872_v35  ;;  %v1492_v7 = vmul.f32 %v1483_v4, %v1478_v27  ;;  %v1493_v33 = vmul.f32 %v1487_v10, %v1478_v27 }
 0x328   :  { %v1559_v29 = vmul.f32 %v1553_v58, %v1434_v61  ;;  %v1494_v26 = vmul.f32 %v1491_v6, %v1478_v27  ;;  %v1585_v37 = vrot.slane %v2761_v36, %v2875_v30  ;;  %v1593_v51 = vrot.slane %v1530_v21, %v2875_v30 }
 0x329   :  { %v1428_v52 = vrot.slane %v1411_v5, %v2876_v44  ;;  %v1469_v60 = vrot.slane %v1411_v5, %v2877_v15  ;;  %v1560_v54 = vmul.f32 %v1557_v46, %v1434_v61  ;;  %v1589_v57 = vrot.slane %v1529_v0, %v2875_v30 }
 0x32a   :  { %v1542_v23 = vrot.slane %v1530_v21, %v2876_v44  ;;  %v1575_v9 = vrot.slane %v1530_v21, %v2877_v15  ;;  %v1596_v45 = vmul.f32 %v1593_v51, %v1478_v27  ;;  %v1420_v40 = vrot.slane %v1409_v62, %v2876_v44 }
 0x32b   :  { %v1431_v22 = vmul.f32 %v1428_v52, %v2743_v50  ;;  %v1424_v8 = vrot.slane %v1410_v53, %v2876_v44  ;;  %v1461_v31 = vrot.slane %v1409_v62, %v2877_v15  ;;  %v1465_v48 = vrot.slane %v1410_v53, %v2877_v15 }
 0x32c   :  { %v1545_v3 = vmul.f32 %v1542_v23, %v2743_v50  ;;  %v1472_v25 = vmul.f32 %v1469_v60, %v1456_v14  ;;  %v1429_v38 = vmul.f32 %v1420_v40, %v2743_v50  ;;  %v1534_v13 = vrot.slane %v2761_v36, %v2876_v44 }
 0x32d   :  { %v1453_v24 = vadd.f32 %v1450_v32, %v1431_v22  ;;  %v1430_v61 = vmul.f32 %v1424_v8, %v2743_v50  ;;  %v1470_v28 = vmul.f32 %v1461_v31, %v1456_v14  ;;  %v1471_v43 = vmul.f32 %v1465_v48, %v1456_v14 }
 0x32e   :  { %v1563_v20 = vadd.f32 %v1560_v54, %v1545_v3  ;;  %v1538_v12 = vrot.slane %v1529_v0, %v2876_v44  ;;  %v1451_v49 = vadd.f32 %v1448_v34, %v1429_v38  ;;  %v1543_v62 = vmul.f32 %v1534_v13, %v2743_v50 }
 0x32f   :  { %v1452_v35 = vadd.f32 %v1449_v59, %v1430_v61  ;;  %v1475_v56 = vadd.f32 %v1472_v25, %v1453_v24  ;;  %v1567_v63 = vrot.slane %v2761_v36, %v2877_v15  ;;  %v1571_v41 = vrot.slane %v1529_v0, %v2877_v15 }
 0x330   :  { %v1544_v53 = vmul.f32 %v1538_v12, %v2743_v50  ;;  %v1578_v47 = vmul.f32 %v1575_v9, %v1456_v14  ;;  %v1473_v39 = vadd.f32 %v1470_v28, %v1451_v49  ;;  %v1561_v18 = vadd.f32 %v1558_v1, %v1543_v62 }
 0x331   :  { %v1474_v16 = vadd.f32 %v1471_v43, %v1452_v35  ;;  %v1497_v42 = vadd.f32 %v1494_v26, %v1475_v56  ;;  %v1576_v30 = vmul.f32 %v1567_v63, %v1456_v14  ;;  %v1577_v4 = vmul.f32 %v1571_v41, %v1456_v14 }
 0x332   :  { %v1562_v19 = vadd.f32 %v1559_v29, %v1544_v53  ;;  %v1581_v5 = vadd.f32 %v1578_v47, %v1563_v20  ;;  %v1594_v2 = vmul.f32 %v1585_v37, %v1478_v27  ;;  %v1495_v55 = vadd.f32 %v1492_v7, %v1473_v39 }
 0x333   :  { %v1496_v11 = vadd.f32 %v1493_v33, %v1474_v16  ;;  %1503 = vst [vmem:[#allocation8 + $0x8] sm:$0xf] %v1497_v42  ;;  %v1595_v17 = vmul.f32 %v1589_v57, %v1478_v27  ;;  %v1579_v50 = vadd.f32 %v1576_v30, %v1561_v18 }
 0x334   :  { %v1580_v10 = vadd.f32 %v1577_v4, %v1562_v19  ;;  %v1599_v21 = vadd.f32 %v1596_v45, %v1581_v5 }
 0x335   :  { %v1500_v36 = vcombine.low %v1495_v55, %v1496_v11  ;;  %v1597_v0 = vadd.f32 %v1594_v2, %v1579_v50 }
 0x336   :  { %v1598_v34 = vadd.f32 %v1595_v17, %v1580_v10  ;;  %1606 = vst [vmem:[#allocation8 + $0x14] sm:$0xf] %v1599_v21 }
 0x337   :  { %1502 = vst [vmem:[#allocation8] sm:$0xff] %v1500_v36 }
 0x338   :  { %v1602_v58 = vcombine.low %v1597_v0, %v1598_v34 }
 0x33a   :  { %1605 = vst [vmem:[#allocation8 + $0xc] sm:$0xff] %v1602_v58 }
 0x33b   :  { %1840 = shalt.err (!%p1837_p0)
}
 0x33c   :  { %s1879_s23 = smov 192   ;;  %s1880_s24 = smov 12  }
 0x33d   :  { %1618 = dma.vmem_to_hbm [thread:$0]  %s1613_s2, 384, %s2807_s5, [#allocation5], %s1879_s23, %s1879_s23, %s1880_s24  }
 0x33e   :  { %1853 = dma.done.wait [#allocation5], 384  }
 0x33f   :  { %1854 = vsyncadd [#allocation5], 4294966912 }
 0x340   :  { %1622 = vsyncpa [#allocation4], 1 }
 0x341   :  { %1623 = vsyncpa [#allocation7], 1 }
 0x342   :  { %1624 = vsyncpa [#allocation5], 1 }

</bundles_post_ra>
